<compile_context>
chip_gen: v7x
topology: tpu7x:2x2x1
jax: 0.10.0
libtpu: 0.0.40
codegen_flags: <defaults>
</compile_context>

<pallas_src>
import functools

import jax
import jax.numpy as jnp
from jax import lax
from jax.experimental import pallas as pl
from jax.experimental.pallas import tpu as pltpu

_MiB = 1024 * 1024


# ---------------------------------------------------------------------------
# Hardware-aware sizing helpers
# ---------------------------------------------------------------------------
def _tpu_budget():
    """Returns (block_budget_bytes, vmem_limit_bytes, n_tensorcores_per_chip)."""
    try:
        kind = jax.devices()[0].device_kind.lower()
    except Exception:
        kind = ""
    if "v6" in kind:                        # v6e: 128 MiB VMEM, 1 TC
        return 28 * _MiB, 64 * _MiB, 1
    if "v7" in kind or "tpu7" in kind:      # v7x: 64 MiB VMEM/TC, 2 TCs
        return 24 * _MiB, 32 * _MiB, 2
    if "v5p" in kind or "v4" in kind:       # megacore parts, 128 MiB VMEM
        return 24 * _MiB, 64 * _MiB, 2
    if "v5" in kind:                        # v5e / v5 lite (16 MiB scoped default)
        return 14 * _MiB, 32 * _MiB, 1
    return 14 * _MiB, 32 * _MiB, 1          # unknown: conservative


def _pick_tile(hw, per_lane, fixed, budget, *, min_tiles=1, max_tile=None):
    """Largest lane tile (a multiple of 128 dividing hw, or hw itself) such
    that fixed + per_lane * tile stays under `budget` bytes of VMEM."""
    if hw < 128 or hw % 128 != 0:
        # TODO(synk): very large non-128-multiple spatial maps fall back to a
        # single full-extent block; a masked tail tile would bound VMEM there.
        return hw
    cap = max(128, ((budget - fixed) // max(per_lane, 1)) // 128 * 128)
    if max_tile is not None:
        cap = min(cap, max(128, (max_tile // 128) * 128))
    best = 128
    for cand in range(128, hw + 1, 128):
        if hw % cand == 0 and cand <= cap and hw // cand >= min_tiles:
            best = cand
    return best


# ---------------------------------------------------------------------------
# Shared in-kernel math: LayerScaler'd squeeze -> attention -> mix columns
# ---------------------------------------------------------------------------
def _attn_weights(sq, prev, oh_ec, oh_ce, *, D, temperature, q_idx):
    """sq: (C,1) sigmoid-squeezed last stage; prev: (C,D) zero-padded at col D-1.
    Returns (keys (C,D), list of D per-depth per-channel weight columns (C,1))."""
    d_iota = lax.broadcasted_iota(jnp.int32, (1, D), 1)
    keys = prev + sq * (d_iota == (D - 1)).astype(jnp.float32)            # (C,D)
    query = jnp.sum(keys * (d_iota == q_idx).astype(jnp.float32),
                    axis=1, keepdims=True)                                # (C,1)
    scores = jnp.dot(oh_ec, query * keys,
                     preferred_element_type=jnp.float32) / temperature    # (heads,D)
    m = jnp.max(scores, axis=1, keepdims=True)
    e = jnp.exp(scores - m)
    w = e / jnp.sum(e, axis=1, keepdims=True)                             # softmax over depth
    wc = jnp.dot(oh_ce, w, preferred_element_type=jnp.float32)            # (C,D)
    wc_cols = [jnp.sum(wc * (d_iota == d).astype(jnp.float32),
                       axis=1, keepdims=True) for d in range(D)]          # D x (C,1)
    return keys, wc_cols


# ---------------------------------------------------------------------------
# Fused kernel: grid (B, 2, T).  Phase 0 pools xs[-1] (read once, stashed in
# VMEM); phase 1 mixes all depths using the resident copy.
# ---------------------------------------------------------------------------
def _fused_kernel(prev_ref, g1_ref, g2_ref, oh_ec_ref, oh_ce_ref,
                  xs_last_ref, xs_rest_ref, o_ref, allsq_ref,
                  last_sc, sum_sc, max_sc, wcol_sc,
                  *, D, temperature, q_idx, hw_total):
    p = pl.program_id(1)
    t = pl.program_id(2)
    nt = pl.num_programs(2)

    @pl.when(p == 0)
    def _pool_phase():
        @pl.when(t == 0)
        def _():
            sum_sc[...] = jnp.zeros_like(sum_sc)
            max_sc[...] = jnp.full(max_sc.shape, -jnp.inf, dtype=max_sc.dtype)

        tile = xs_last_ref[0, 0]                              # (C, THW)
        last_sc[t] = tile                                     # keep resident for phase 1
        tf = tile.astype(jnp.float32)                         # f32 pooling accumulation
        sum_sc[...] = sum_sc[...] + jnp.sum(tf, axis=1, keepdims=True)
        max_sc[...] = jnp.maximum(max_sc[...], jnp.max(tf, axis=1, keepdims=True))

        @pl.when(t == nt - 1)
        def _():
            avg = sum_sc[...] * (1.0 / hw_total)
            sq = jax.nn.sigmoid(g1_ref[...] * avg + g2_ref[...] * max_sc[...])
            keys, wc_cols = _attn_weights(sq, prev_ref[0], oh_ec_ref[...],
                                          oh_ce_ref[...], D=D,
                                          temperature=temperature, q_idx=q_idx)
            allsq_ref[0] = keys
            for d in range(D):
                wcol_sc[d] = wc_cols[d]

    @pl.when(p == 1)
    def _mix_phase():
        acc = last_sc[t] * wcol_sc[D - 1]                     # (C, THW)
        for d in range(D - 1):
            acc = acc + xs_rest_ref[d, 0] * wcol_sc[d]
        o_ref[0] = acc.astype(o_ref.dtype)


# ---------------------------------------------------------------------------
# Two-pass fallback kernels
# ---------------------------------------------------------------------------
def _pool_attn_kernel(prev_ref, g1_ref, g2_ref, oh_ec_ref, oh_ce_ref, xs_last_ref,
                      allsq_ref, wc_ref, sum_sc, max_sc,
                      *, D, temperature, q_idx, hw_total):
    t = pl.program_id(1)

    @pl.when(t == 0)
    def _():
        sum_sc[...] = jnp.zeros_like(sum_sc)
        max_sc[...] = jnp.full(max_sc.shape, -jnp.inf, dtype=max_sc.dtype)

    tf = xs_last_ref[0, 0].astype(jnp.float32)                # (C, TA)
    sum_sc[...] = sum_sc[...] + jnp.sum(tf, axis=1, keepdims=True)
    max_sc[...] = jnp.maximum(max_sc[...], jnp.max(tf, axis=1, keepdims=True))

    @pl.when(t == pl.num_programs(1) - 1)
    def _():
        avg = sum_sc[...] * (1.0 / hw_total)
        sq = jax.nn.sigmoid(g1_ref[...] * avg + g2_ref[...] * max_sc[...])
        keys, wc_cols = _attn_weights(sq, prev_ref[0], oh_ec_ref[...],
                                      oh_ce_ref[...], D=D,
                                      temperature=temperature, q_idx=q_idx)
        allsq_ref[0] = keys
        for d in range(D):
            wc_ref[0, d] = wc_cols[d]                         # (B, D, C, 1) layout


def _mix_kernel(wc_ref, xs_ref, o_ref, *, D):
    # wc_ref: (1, D, C, 1); xs_ref: (D, 1, C, THW); o_ref: (1, C, THW)
    acc = xs_ref[0, 0] * wc_ref[0, 0]
    for d in range(1, D):
        acc = acc + xs_ref[d, 0] * wc_ref[0, d]
    o_ref[0] = acc.astype(o_ref.dtype)


# ---------------------------------------------------------------------------
# Wrapper
# ---------------------------------------------------------------------------
def attn_layer_forward(xs, all_squeezed, gamma_avg, gamma_max, *,
                       num_heads, temperature=1.0, query_idx=-1,
                       force_path=None, max_tile_lanes=None):
    """xs: (D, B, C, H, W); all_squeezed: (D-1, B, C) (PyTorch layout).
    Returns (x_new (B, C, H, W), all_squeezed_new (D, B, C))."""
    D, B, C, H, W = xs.shape
    Dprev = all_squeezed.shape[0]
    assert Dprev == D - 1 and C % num_heads == 0
    HW = H * W
    q_idx = query_idx % D

    budget, vmem_limit, num_tc = _tpu_budget()
    in_isz = xs.dtype.itemsize
    out_isz = in_isz

    # ---- glue (no transpose / copy of the big xs tensor) ----
    xs_k = xs.reshape(D, B, C, HW)                                       # free
    prev_k = jnp.transpose(all_squeezed.astype(jnp.float32), (1, 2, 0))  # (B,C,Dprev)
    prev_pad = jnp.pad(prev_k, ((0, 0), (0, 0), (0, D - Dprev)))         # (B,C,D)
    g1 = gamma_avg.astype(jnp.float32).reshape(C, 1)
    g2 = gamma_max.astype(jnp.float32).reshape(C, 1)
    head_dim = C // num_heads
    head_of_c = jnp.arange(C, dtype=jnp.int32) // head_dim
    oh_ec = (jnp.arange(num_heads, dtype=jnp.int32)[:, None]
             == head_of_c[None, :]).astype(jnp.float32)                  # (heads,C)
    oh_ce = jnp.transpose(oh_ec)                                         # (C,heads)

    def cparams(sem):
        return pltpu.CompilerParams(dimension_semantics=sem,
                                    vmem_limit_bytes=vmem_limit)

    # ---- path selection: fused single HBM pass when xs[-1] fits VMEM ----
    fused_fixed = C * HW * in_isz                        # resident xs[-1] scratch
    fused_per_lane = 2 * C * (D * in_isz + out_isz)      # double-buffered stream + out
    thw_f = _pick_tile(HW, fused_per_lane, fused_fixed, budget,
                       max_tile=max_tile_lanes)
    fused_fits = fused_fixed + fused_per_lane * thw_f <= budget
    use_fused = (D >= 2) and fused_fits and not (B == 1 and num_tc > 1)
    if force_path == "fused":
        use_fused = D >= 2
    elif force_path == "two_pass":
        use_fused = False

    if use_fused:
        T = HW // thw_f
        kern = functools.partial(_fused_kernel, D=D, temperature=float(temperature),
                                 q_idx=q_idx, hw_total=float(HW))
        cost = pl.CostEstimate(
            flops=int(B * C * HW * (2 * D + 4)),
            transcendentals=int(B * (C + num_heads * D)),
            bytes_accessed=int(B * C * HW * (D * in_isz + out_isz) + 8 * B * C * D))
        x_new_k, allsq_k = pl.pallas_call(
            kern,
            out_shape=[jax.ShapeDtypeStruct((B, C, HW), xs.dtype),
                       jax.ShapeDtypeStruct((B, C, D), jnp.float32)],
            grid=(B, 2, T),
            in_specs=[
                pl.BlockSpec((1, C, D), lambda b, p, t: (b, 0, 0)),
                pl.BlockSpec((C, 1), lambda b, p, t: (0, 0)),
                pl.BlockSpec((C, 1), lambda b, p, t: (0, 0)),
                pl.BlockSpec((num_heads, C), lambda b, p, t: (0, 0)),
                pl.BlockSpec((C, num_heads), lambda b, p, t: (0, 0)),
                # xs[-1] stream: walks HW tiles in phase 0, parked afterwards
                pl.BlockSpec((1, 1, C, thw_f),
                             lambda b, p, t: (D - 1, b, 0, t * (1 - p) + (T - 1) * p)),
                # xs[0:D-1] stream: parked on tile 0 in phase 0, walks in phase 1
                pl.BlockSpec((D - 1, 1, C, thw_f),
                             lambda b, p, t: (0, b, 0, t * p)),
            ],
            out_specs=[
                pl.BlockSpec((1, C, thw_f), lambda b, p, t: (b, 0, t * p)),
                pl.BlockSpec((1, C, D), lambda b, p, t: (b, 0, 0)),
            ],
            scratch_shapes=[
                pltpu.VMEM((T, C, thw_f), xs.dtype),   # resident copy of xs[-1]
                pltpu.VMEM((C, 1), jnp.float32),       # running pooled sum
                pltpu.VMEM((C, 1), jnp.float32),       # running pooled max
                pltpu.VMEM((D, C, 1), jnp.float32),    # per-channel mix columns
            ],
            compiler_params=cparams(("parallel", "arbitrary", "arbitrary")),
            cost_estimate=cost,
        )(prev_pad, g1, g2, oh_ec, oh_ce, xs_k, xs_k)
    else:
        # ---- pass 1: HW-tiled pooled squeeze + attention weights ----
        ta = _pick_tile(HW, 2 * C * in_isz, 0, budget, max_tile=max_tile_lanes)
        TA = HW // ta
        kern_a = functools.partial(_pool_attn_kernel, D=D,
                                   temperature=float(temperature), q_idx=q_idx,
                                   hw_total=float(HW))
        cost_a = pl.CostEstimate(
            flops=int(4 * B * C * HW),
            transcendentals=int(B * (C + num_heads * D)),
            bytes_accessed=int(B * C * HW * in_isz + 8 * B * C * D))
        allsq_k, wc_k = pl.pallas_call(
            kern_a,
            out_shape=[jax.ShapeDtypeStruct((B, C, D), jnp.float32),
                       jax.ShapeDtypeStruct((B, D, C, 1), jnp.float32)],
            grid=(B, TA),
            in_specs=[
                pl.BlockSpec((1, C, D), lambda b, t: (b, 0, 0)),
                pl.BlockSpec((C, 1), lambda b, t: (0, 0)),
                pl.BlockSpec((C, 1), lambda b, t: (0, 0)),
                pl.BlockSpec((num_heads, C), lambda b, t: (0, 0)),
                pl.BlockSpec((C, num_heads), lambda b, t: (0, 0)),
                pl.BlockSpec((1, 1, C, ta), lambda b, t: (D - 1, b, 0, t)),
            ],
            out_specs=[
                pl.BlockSpec((1, C, D), lambda b, t: (b, 0, 0)),
                pl.BlockSpec((1, D, C, 1), lambda b, t: (b, 0, 0, 0)),
            ],
            scratch_shapes=[pltpu.VMEM((C, 1), jnp.float32),
                            pltpu.VMEM((C, 1), jnp.float32)],
            compiler_params=cparams(("parallel", "arbitrary")),
            cost_estimate=cost_a,
        )(prev_pad, g1, g2, oh_ec, oh_ce, xs_k)

        # ---- pass 2: weighted depth mix, tiled over (batch, HW) ----
        min_tiles = 2 if (B == 1 and num_tc > 1) else 1   # carry megacore split on T
        thw = _pick_tile(HW, 2 * C * (D * in_isz + out_isz), 0, budget,
                         min_tiles=min_tiles, max_tile=max_tile_lanes)
        T = HW // thw
        kern_b = functools.partial(_mix_kernel, D=D)
        cost_b = pl.CostEstimate(
            flops=int(2 * B * D * C * HW),
            transcendentals=0,
            bytes_accessed=int(B * C * HW * (D * in_isz + out_isz) + 4 * B * C * D))
        x_new_k = pl.pallas_call(
            kern_b,
            out_shape=jax.ShapeDtypeStruct((B, C, HW), xs.dtype),
            grid=(B, T),
            in_specs=[
                pl.BlockSpec((1, D, C, 1), lambda b, t: (b, 0, 0, 0)),
                pl.BlockSpec((D, 1, C, thw), lambda b, t: (0, b, 0, t)),
            ],
            out_specs=pl.BlockSpec((1, C, thw), lambda b, t: (b, 0, t)),
            compiler_params=cparams(("parallel", "parallel")),
            cost_estimate=cost_b,
        )(wc_k, xs_k)

    # ---- glue back to PyTorch layouts (both cheap) ----
    x_new = x_new_k.reshape(B, C, H, W)
    all_squeezed_new = jnp.transpose(allsq_k, (2, 0, 1))                 # tiny
    return x_new, all_squeezed_new


# ---------------------------------------------------------------------------
# Pure-JAX reference (replica of the PyTorch forward)
# ---------------------------------------------------------------------------
def _reference(xs, all_squeezed, gamma_avg, gamma_max, *,
               num_heads, temperature=1.0, query_idx=-1):
    D, B, C, H, W = xs.shape
    last = xs[-1]
    avg = last.mean(axis=(2, 3))
    mx = last.max(axis=(2, 3))
    sq = jax.nn.sigmoid(gamma_avg[None, :] * avg + gamma_max[None, :] * mx)
    all_sq = jnp.concatenate([all_squeezed, sq[None]], axis=0)        # (D, B, C)
    query = all_sq[query_idx]                                         # (B, C)
    hd = C // num_heads
    q = query.reshape(B, num_heads, hd)
    k = all_sq.reshape(D, B, num_heads, hd)
    attn = jnp.einsum('beh,dbeh->dbe', q, k) / temperature
    attn = jax.nn.softmax(attn, axis=0)
    xs_r = xs.reshape(D, B, num_heads, hd, H, W)
    x_new = jnp.einsum('dbehvw,dbe->behvw', xs_r, attn).reshape(B, C, H, W)
    return x_new, all_sq


def _check(tag, out, ref, atol_x, rtol_x):
    x, s = out
    xr, sr = ref
    assert x.shape == xr.shape and s.shape == sr.shape, tag
    assert jnp.allclose(x.astype(jnp.float32), xr, atol=atol_x, rtol=rtol_x), tag
    assert jnp.allclose(s.astype(jnp.float32), sr, atol=1e-5, rtol=1e-5), tag


if __name__ == "__main__":
    # small, forward-consistent shapes
    D, B, C, H, W = 3, 2, 32, 16, 16          # D = depth of xs stack (= len(all_squeezed) + 1)
    num_heads = 4
    temperature = 1.0
    init_scale = 1.0

    key = jax.random.PRNGKey(0)
    k1, k2, k3, k4 = jax.random.split(key, 4)
    xs = jax.random.normal(k1, (D, B, C, H, W), dtype=jnp.float32)
    all_squeezed = jax.random.uniform(k2, (D - 1, B, C), dtype=jnp.float32)
    gamma_avg = init_scale * (1.0 + 0.05 * jax.random.normal(k3, (C,), dtype=jnp.float32))
    gamma_max = init_scale * (1.0 + 0.05 * jax.random.normal(k4, (C,), dtype=jnp.float32))

    ref = _reference(xs, all_squeezed, gamma_avg, gamma_max,
                     num_heads=num_heads, temperature=temperature, query_idx=-1)
    run = functools.partial(attn_layer_forward, num_heads=num_heads,
                            temperature=temperature, query_idx=-1)

    # 1) default path (fused single HBM pass)
    out = run(xs, all_squeezed, gamma_avg, gamma_max)
    jax.block_until_ready(out)
    _check("auto", out, ref, 1e-5, 1e-5)

    # 2) fused path with a small tile: exercises the two-phase grid and the
    #    resident xs[-1] VMEM scratch across multiple HW tiles.
    out = run(xs, all_squeezed, gamma_avg, gamma_max,
              force_path="fused", max_tile_lanes=128)
    jax.block_until_ready(out)
    _check("fused_tiled", out, ref, 1e-5, 1e-5)

    # 3) two-pass fallback (tiled pooling kernel + lane-dense mix kernel)
    out = run(xs, all_squeezed, gamma_avg, gamma_max,
              force_path="two_pass", max_tile_lanes=128)
    jax.block_until_ready(out)
    _check("two_pass", out, ref, 1e-5, 1e-5)

    # 4) bf16 inputs: dtype-aware tiling + f32 pooling accumulation in-kernel
    xs_bf = xs.astype(jnp.bfloat16)
    sq_bf = all_squeezed.astype(jnp.bfloat16)
    ga_bf = gamma_avg.astype(jnp.bfloat16)
    gm_bf = gamma_max.astype(jnp.bfloat16)
    ref_bf = _reference(xs_bf.astype(jnp.float32), sq_bf.astype(jnp.float32),
                        ga_bf.astype(jnp.float32), gm_bf.astype(jnp.float32),
                        num_heads=num_heads, temperature=temperature, query_idx=-1)
    out = run(xs_bf, sq_bf, ga_bf, gm_bf)
    jax.block_until_ready(out)
    _check("bf16", out, ref_bf, 5e-2, 2e-2)

    print("KERNEL_OK")
</pallas_src>

<mosaic_0001>
module attributes {stable_mosaic.version = 11 : i64} {
  func.func @_fused_kernel(%arg0: i32, %arg1: i32, %arg2: i32, %arg3: memref<1x32x3xf32, #tpu.memory_space<vmem>>, %arg4: memref<32x1xf32, #tpu.memory_space<vmem>>, %arg5: memref<32x1xf32, #tpu.memory_space<vmem>>, %arg6: memref<4x32xf32, #tpu.memory_space<vmem>>, %arg7: memref<32x4xf32, #tpu.memory_space<vmem>>, %arg8: memref<1x1x32x256xf32, #tpu.memory_space<vmem>>, %arg9: memref<2x1x32x256xf32, #tpu.memory_space<vmem>>, %arg10: memref<1x32x256xf32, #tpu.memory_space<vmem>>, %arg11: memref<1x32x3xf32, #tpu.memory_space<vmem>>, %arg12: memref<1x32x256xf32, #tpu.memory_space<vmem>>, %arg13: memref<32x1xf32, #tpu.memory_space<vmem>>, %arg14: memref<32x1xf32, #tpu.memory_space<vmem>>, %arg15: memref<3x32x1xf32, #tpu.memory_space<vmem>>) attributes {dimension_semantics = [#tpu.dimension_semantics<parallel>, #tpu.dimension_semantics<arbitrary>, #tpu.dimension_semantics<arbitrary>], iteration_bounds = array<i64: 2, 2, 1>, scalar_prefetch = 0 : i64, scratch_operands = 4 : i64, tpu.core_type = #tpu.core_type<tc>, window_params = [{transform_indices = @transform_0, window_bounds = array<i64: 1, 32, 3>}, {pipeline_mode = #tpu.pipeline_mode<synchronous>, transform_indices = @transform_1, window_bounds = array<i64: 32, 1>}, {pipeline_mode = #tpu.pipeline_mode<synchronous>, transform_indices = @transform_2, window_bounds = array<i64: 32, 1>}, {pipeline_mode = #tpu.pipeline_mode<synchronous>, transform_indices = @transform_3, window_bounds = array<i64: 4, 32>}, {pipeline_mode = #tpu.pipeline_mode<synchronous>, transform_indices = @transform_4, window_bounds = array<i64: 32, 4>}, {transform_indices = @transform_5, window_bounds = array<i64: 1, 1, 32, 256>}, {transform_indices = @transform_6, window_bounds = array<i64: 2, 1, 32, 256>}, {transform_indices = @transform_7, window_bounds = array<i64: 1, 32, 256>}, {transform_indices = @transform_8, window_bounds = array<i64: 1, 32, 3>}]} {
    %c0_i32 = arith.constant 0 : i32
    %0 = arith.cmpi eq, %arg1, %c0_i32 : i32
    %1 = arith.extui %0 : i1 to i32
    %c0_i32_0 = arith.constant 0 : i32
    %2 = arith.cmpi ne, %1, %c0_i32_0 : i32
    scf.if %2 {
      %c0_i32_2 = arith.constant 0 : i32
      %6 = arith.cmpi eq, %arg2, %c0_i32_2 : i32
      %7 = arith.extui %6 : i1 to i32
      %c0_i32_3 = arith.constant 0 : i32
      %8 = arith.cmpi ne, %7, %c0_i32_3 : i32
      scf.if %8 {
        %cst_20 = arith.constant 0.000000e+00 : f32
        %28 = vector.broadcast %cst_20 : f32 to vector<32x1xf32>
        %c0_21 = arith.constant 0 : index
        %c0_22 = arith.constant 0 : index
        %29 = vector.load %arg13[%c0_21, %c0_22] : memref<32x1xf32, #tpu.memory_space<vmem>>, vector<32x1xf32>
        tpu.vector_store %arg13[%c0_21, %c0_22], %28 {strides = array<i32>} : memref<32x1xf32, #tpu.memory_space<vmem>>, vector<32x1xf32>,
        %cst_23 = arith.constant 0xFF800000 : f32
        %30 = vector.broadcast %cst_23 : f32 to vector<32x1xf32>
        %c0_24 = arith.constant 0 : index
        %c0_25 = arith.constant 0 : index
        %31 = vector.load %arg14[%c0_24, %c0_25] : memref<32x1xf32, #tpu.memory_space<vmem>>, vector<32x1xf32>
        tpu.vector_store %arg14[%c0_24, %c0_25], %30 {strides = array<i32>} : memref<32x1xf32, #tpu.memory_space<vmem>>, vector<32x1xf32>,
      } else {
      }
      %c0 = arith.constant 0 : index
      %c0_4 = arith.constant 0 : index
      %c0_5 = arith.constant 0 : index
      %c0_6 = arith.constant 0 : index
      %9 = vector.load %arg8[%c0, %c0_4, %c0_5, %c0_6] : memref<1x1x32x256xf32, #tpu.memory_space<vmem>>, vector<1x1x32x256xf32>
      %10 = vector.shape_cast %9 : vector<1x1x32x256xf32> to vector<32x256xf32>
      %11 = arith.index_cast %arg2 : i32 to index
      %c0_7 = arith.constant 0 : index
      %c0_8 = arith.constant 0 : index
      %12 = vector.load %arg12[%11, %c0_7, %c0_8] : memref<1x32x256xf32, #tpu.memory_space<vmem>>, vector<1x32x256xf32>
      %13 = vector.shape_cast %12 : vector<1x32x256xf32> to vector<32x256xf32>
      %14 = vector.shape_cast %10 : vector<32x256xf32> to vector<1x32x256xf32>
      tpu.vector_store %arg12[%11, %c0_7, %c0_8], %14 {strides = array<i32>} : memref<1x32x256xf32, #tpu.memory_space<vmem>>, vector<1x32x256xf32>,
      %c0_9 = arith.constant 0 : index
      %c0_10 = arith.constant 0 : index
      %15 = vector.load %arg13[%c0_9, %c0_10] : memref<32x1xf32, #tpu.memory_space<vmem>>, vector<32x1xf32>
      %cst = arith.constant dense<0.000000e+00> : vector<32xf32>
      %16 = vector.multi_reduction <add>, %10, %cst [1] : vector<32x256xf32> to vector<32xf32>
      %17 = vector.shape_cast %16 : vector<32xf32> to vector<32x1xf32>
      %18 = arith.addf %15, %17 : vector<32x1xf32>
      %c0_11 = arith.constant 0 : index
      %c0_12 = arith.constant 0 : index
      %19 = vector.load %arg13[%c0_11, %c0_12] : memref<32x1xf32, #tpu.memory_space<vmem>>, vector<32x1xf32>
      tpu.vector_store %arg13[%c0_11, %c0_12], %18 {strides = array<i32>} : memref<32x1xf32, #tpu.memory_space<vmem>>, vector<32x1xf32>,
      %c0_13 = arith.constant 0 : index
      %c0_14 = arith.constant 0 : index
      %20 = vector.load %arg14[%c0_13, %c0_14] : memref<32x1xf32, #tpu.memory_space<vmem>>, vector<32x1xf32>
      %cst_15 = arith.constant dense<0xFF800000> : vector<32xf32>
      %21 = vector.multi_reduction <maximumf>, %10, %cst_15 [1] : vector<32x256xf32> to vector<32xf32>
      %22 = vector.shape_cast %21 : vector<32xf32> to vector<32x1xf32>
      %23 = arith.maximumf %20, %22 : vector<32x1xf32>
      %c0_16 = arith.constant 0 : index
      %c0_17 = arith.constant 0 : index
      %24 = vector.load %arg14[%c0_16, %c0_17] : memref<32x1xf32, #tpu.memory_space<vmem>>, vector<32x1xf32>
      tpu.vector_store %arg14[%c0_16, %c0_17], %23 {strides = array<i32>} : memref<32x1xf32, #tpu.memory_space<vmem>>, vector<32x1xf32>,
      %c0_i32_18 = arith.constant 0 : i32
      %25 = arith.cmpi eq, %arg2, %c0_i32_18 : i32
      %26 = arith.extui %25 : i1 to i32
      %c0_i32_19 = arith.constant 0 : i32
      %27 = arith.cmpi ne, %26, %c0_i32_19 : i32
      scf.if %27 {
        %c0_20 = arith.constant 0 : index
        %c0_21 = arith.constant 0 : index
        %28 = vector.load %arg13[%c0_20, %c0_21] : memref<32x1xf32, #tpu.memory_space<vmem>>, vector<32x1xf32>
        %cst_22 = arith.constant 3.906250e-03 : f32
        %29 = vector.broadcast %cst_22 : f32 to vector<32x1xf32>
        %30 = arith.mulf %28, %29 : vector<32x1xf32>
        %c0_23 = arith.constant 0 : index
        %c0_24 = arith.constant 0 : index
        %31 = vector.load %arg4[%c0_23, %c0_24] : memref<32x1xf32, #tpu.memory_space<vmem>>, vector<32x1xf32>
        %32 = arith.mulf %31, %30 : vector<32x1xf32>
        %c0_25 = arith.constant 0 : index
        %c0_26 = arith.constant 0 : index
        %33 = vector.load %arg5[%c0_25, %c0_26] : memref<32x1xf32, #tpu.memory_space<vmem>>, vector<32x1xf32>
        %c0_27 = arith.constant 0 : index
        %c0_28 = arith.constant 0 : index
        %34 = vector.load %arg14[%c0_27, %c0_28] : memref<32x1xf32, #tpu.memory_space<vmem>>, vector<32x1xf32>
        %35 = arith.mulf %33, %34 : vector<32x1xf32>
        %36 = arith.addf %32, %35 : vector<32x1xf32>
        %37 = arith.negf %36 : vector<32x1xf32>
        %38 = math.exp %37 : vector<32x1xf32>
        %cst_29 = arith.constant 1.000000e+00 : f32
        %39 = vector.broadcast %cst_29 : f32 to vector<32x1xf32>
        %40 = arith.addf %39, %38 : vector<32x1xf32>
        %41 = arith.divf %39, %40 : vector<32x1xf32>
        %c0_30 = arith.constant 0 : index
        %c0_31 = arith.constant 0 : index
        %c0_32 = arith.constant 0 : index
        %42 = vector.load %arg3[%c0_30, %c0_31, %c0_32] : memref<1x32x3xf32, #tpu.memory_space<vmem>>, vector<1x32x3xf32>
        %43 = vector.shape_cast %42 : vector<1x32x3xf32> to vector<32x3xf32>
        %c0_33 = arith.constant 0 : index
        %c0_34 = arith.constant 0 : index
        %44 = vector.load %arg6[%c0_33, %c0_34] : memref<4x32xf32, #tpu.memory_space<vmem>>, vector<4x32xf32>
        %c0_35 = arith.constant 0 : index
        %c0_36 = arith.constant 0 : index
        %45 = vector.load %arg7[%c0_35, %c0_36] : memref<32x4xf32, #tpu.memory_space<vmem>>, vector<32x4xf32>
        %46 = tpu.iota {dimensions = array<i32: 1>} : vector<1x3xi32>
        %c2_i32 = arith.constant 2 : i32
        %47 = vector.broadcast %c2_i32 : i32 to vector<1x3xi32>
        %48 = arith.cmpi eq, %46, %47 : vector<1x3xi32>
        %49 = arith.extui %48 : vector<1x3xi1> to vector<1x3xi32>
        %50 = arith.sitofp %49 : vector<1x3xi32> to vector<1x3xf32>
        %51 = vector.broadcast %41 : vector<32x1xf32> to vector<32x3xf32>
        %52 = vector.broadcast %50 : vector<1x3xf32> to vector<32x3xf32>
        %53 = arith.mulf %51, %52 : vector<32x3xf32>
        %54 = arith.addf %43, %53 : vector<32x3xf32>
        %c2_i32_37 = arith.constant 2 : i32
        %55 = vector.broadcast %c2_i32_37 : i32 to vector<1x3xi32>
        %56 = arith.cmpi eq, %46, %55 : vector<1x3xi32>
        %57 = arith.extui %56 : vector<1x3xi1> to vector<1x3xi32>
        %58 = arith.sitofp %57 : vector<1x3xi32> to vector<1x3xf32>
        %59 = vector.broadcast %58 : vector<1x3xf32> to vector<32x3xf32>
        %60 = arith.mulf %54, %59 : vector<32x3xf32>
        %cst_38 = arith.constant dense<0.000000e+00> : vector<32xf32>
        %61 = vector.multi_reduction <add>, %60, %cst_38 [1] : vector<32x3xf32> to vector<32xf32>
        %62 = vector.shape_cast %61 : vector<32xf32> to vector<32x1xf32>
        %63 = vector.broadcast %62 : vector<32x1xf32> to vector<32x3xf32>
        %64 = arith.mulf %63, %54 : vector<32x3xf32>
        %cst_39 = arith.constant dense<0.000000e+00> : vector<4x3xf32>
        %65 = tpu.matmul %44, %64, %cst_39 {dimension_numbers = #tpu.dot_dimension_numbers<[1], [0], [0], [1], [0, 0, 1, 1], [], []>} : vector<4x32xf32>, vector<32x3xf32>, vector<4x3xf32> -> vector<4x3xf32>
        %cst_40 = arith.constant 1.000000e+00 : f32
        %66 = vector.broadcast %cst_40 : f32 to vector<4x3xf32>
        %67 = arith.divf %65, %66 : vector<4x3xf32>
        %cst_41 = arith.constant dense<0xFF800000> : vector<4xf32>
        %68 = vector.multi_reduction <maximumf>, %67, %cst_41 [1] : vector<4x3xf32> to vector<4xf32>
        %69 = vector.shape_cast %68 : vector<4xf32> to vector<4x1xf32>
        %70 = vector.broadcast %69 : vector<4x1xf32> to vector<4x3xf32>
        %71 = arith.subf %67, %70 : vector<4x3xf32>
        %72 = math.exp %71 : vector<4x3xf32>
        %cst_42 = arith.constant dense<0.000000e+00> : vector<4xf32>
        %73 = vector.multi_reduction <add>, %72, %cst_42 [1] : vector<4x3xf32> to vector<4xf32>
        %74 = vector.shape_cast %73 : vector<4xf32> to vector<4x1xf32>
        %75 = vector.broadcast %74 : vector<4x1xf32> to vector<4x3xf32>
        %76 = arith.divf %72, %75 : vector<4x3xf32>
        %cst_43 = arith.constant dense<0.000000e+00> : vector<32x3xf32>
        %77 = tpu.matmul %45, %76, %cst_43 {dimension_numbers = #tpu.dot_dimension_numbers<[1], [0], [0], [1], [0, 0, 1, 1], [], []>} : vector<32x4xf32>, vector<4x3xf32>, vector<32x3xf32> -> vector<32x3xf32>
        %c0_i32_44 = arith.constant 0 : i32
        %78 = vector.broadcast %c0_i32_44 : i32 to vector<1x3xi32>
        %79 = arith.cmpi eq, %46, %78 : vector<1x3xi32>
        %80 = arith.extui %79 : vector<1x3xi1> to vector<1x3xi32>
        %81 = arith.sitofp %80 : vector<1x3xi32> to vector<1x3xf32>
        %82 = vector.broadcast %81 : vector<1x3xf32> to vector<32x3xf32>
        %83 = arith.mulf %77, %82 : vector<32x3xf32>
        %cst_45 = arith.constant dense<0.000000e+00> : vector<32xf32>
        %84 = vector.multi_reduction <add>, %83, %cst_45 [1] : vector<32x3xf32> to vector<32xf32>
        %85 = vector.shape_cast %84 : vector<32xf32> to vector<32x1xf32>
        %c1_i32_46 = arith.constant 1 : i32
        %86 = vector.broadcast %c1_i32_46 : i32 to vector<1x3xi32>
        %87 = arith.cmpi eq, %46, %86 : vector<1x3xi32>
        %88 = arith.extui %87 : vector<1x3xi1> to vector<1x3xi32>
        %89 = arith.sitofp %88 : vector<1x3xi32> to vector<1x3xf32>
        %90 = vector.broadcast %89 : vector<1x3xf32> to vector<32x3xf32>
        %91 = arith.mulf %77, %90 : vector<32x3xf32>
        %cst_47 = arith.constant dense<0.000000e+00> : vector<32xf32>
        %92 = vector.multi_reduction <add>, %91, %cst_47 [1] : vector<32x3xf32> to vector<32xf32>
        %93 = vector.shape_cast %92 : vector<32xf32> to vector<32x1xf32>
        %c2_i32_48 = arith.constant 2 : i32
        %94 = vector.broadcast %c2_i32_48 : i32 to vector<1x3xi32>
        %95 = arith.cmpi eq, %46, %94 : vector<1x3xi32>
        %96 = arith.extui %95 : vector<1x3xi1> to vector<1x3xi32>
        %97 = arith.sitofp %96 : vector<1x3xi32> to vector<1x3xf32>
        %98 = vector.broadcast %97 : vector<1x3xf32> to vector<32x3xf32>
        %99 = arith.mulf %77, %98 : vector<32x3xf32>
        %cst_49 = arith.constant dense<0.000000e+00> : vector<32xf32>
        %100 = vector.multi_reduction <add>, %99, %cst_49 [1] : vector<32x3xf32> to vector<32xf32>
        %101 = vector.shape_cast %100 : vector<32xf32> to vector<32x1xf32>
        %c0_50 = arith.constant 0 : index
        %c0_51 = arith.constant 0 : index
        %c0_52 = arith.constant 0 : index
        %102 = vector.load %arg11[%c0_50, %c0_51, %c0_52] : memref<1x32x3xf32, #tpu.memory_space<vmem>>, vector<1x32x3xf32>
        %103 = vector.shape_cast %102 : vector<1x32x3xf32> to vector<32x3xf32>
        %104 = vector.shape_cast %54 : vector<32x3xf32> to vector<1x32x3xf32>
        tpu.vector_store %arg11[%c0_50, %c0_51, %c0_52], %104 {strides = array<i32>} : memref<1x32x3xf32, #tpu.memory_space<vmem>>, vector<1x32x3xf32>,
        %c0_53 = arith.constant 0 : index
        %c0_54 = arith.constant 0 : index
        %c0_55 = arith.constant 0 : index
        %105 = vector.load %arg15[%c0_53, %c0_54, %c0_55] : memref<3x32x1xf32, #tpu.memory_space<vmem>>, vector<1x32x1xf32>
        %106 = vector.shape_cast %105 : vector<1x32x1xf32> to vector<32x1xf32>
        %107 = vector.shape_cast %85 : vector<32x1xf32> to vector<1x32x1xf32>
        tpu.vector_store %arg15[%c0_53, %c0_54, %c0_55], %107 {strides = array<i32>} : memref<3x32x1xf32, #tpu.memory_space<vmem>>, vector<1x32x1xf32>,
        %c1 = arith.constant 1 : index
        %c0_56 = arith.constant 0 : index
        %c0_57 = arith.constant 0 : index
        %108 = vector.load %arg15[%c1, %c0_56, %c0_57] : memref<3x32x1xf32, #tpu.memory_space<vmem>>, vector<1x32x1xf32>
        %109 = vector.shape_cast %108 : vector<1x32x1xf32> to vector<32x1xf32>
        %110 = vector.shape_cast %93 : vector<32x1xf32> to vector<1x32x1xf32>
        tpu.vector_store %arg15[%c1, %c0_56, %c0_57], %110 {strides = array<i32>} : memref<3x32x1xf32, #tpu.memory_space<vmem>>, vector<1x32x1xf32>,
        %c2 = arith.constant 2 : index
        %c0_58 = arith.constant 0 : index
        %c0_59 = arith.constant 0 : index
        %111 = vector.load %arg15[%c2, %c0_58, %c0_59] : memref<3x32x1xf32, #tpu.memory_space<vmem>>, vector<1x32x1xf32>
        %112 = vector.shape_cast %111 : vector<1x32x1xf32> to vector<32x1xf32>
        %113 = vector.shape_cast %101 : vector<32x1xf32> to vector<1x32x1xf32>
        tpu.vector_store %arg15[%c2, %c0_58, %c0_59], %113 {strides = array<i32>} : memref<3x32x1xf32, #tpu.memory_space<vmem>>, vector<1x32x1xf32>,
      } else {
      }
    } else {
    }
    %c1_i32 = arith.constant 1 : i32
    %3 = arith.cmpi eq, %arg1, %c1_i32 : i32
    %4 = arith.extui %3 : i1 to i32
    %c0_i32_1 = arith.constant 0 : i32
    %5 = arith.cmpi ne, %4, %c0_i32_1 : i32
    scf.if %5 {
      %6 = arith.index_cast %arg2 : i32 to index
      %c0 = arith.constant 0 : index
      %c0_2 = arith.constant 0 : index
      %7 = vector.load %arg12[%6, %c0, %c0_2] : memref<1x32x256xf32, #tpu.memory_space<vmem>>, vector<1x32x256xf32>
      %8 = vector.shape_cast %7 : vector<1x32x256xf32> to vector<32x256xf32>
      %c2 = arith.constant 2 : index
      %c0_3 = arith.constant 0 : index
      %c0_4 = arith.constant 0 : index
      %9 = vector.load %arg15[%c2, %c0_3, %c0_4] : memref<3x32x1xf32, #tpu.memory_space<vmem>>, vector<1x32x1xf32>
      %10 = vector.shape_cast %9 : vector<1x32x1xf32> to vector<32x1xf32>
      %11 = vector.broadcast %10 : vector<32x1xf32> to vector<32x256xf32>
      %12 = arith.mulf %8, %11 : vector<32x256xf32>
      %c0_5 = arith.constant 0 : index
      %c0_6 = arith.constant 0 : index
      %c0_7 = arith.constant 0 : index
      %c0_8 = arith.constant 0 : index
      %13 = vector.load %arg9[%c0_5, %c0_6, %c0_7, %c0_8] : memref<2x1x32x256xf32, #tpu.memory_space<vmem>>, vector<1x1x32x256xf32>
      %14 = vector.shape_cast %13 : vector<1x1x32x256xf32> to vector<32x256xf32>
      %c0_9 = arith.constant 0 : index
      %c0_10 = arith.constant 0 : index
      %c0_11 = arith.constant 0 : index
      %15 = vector.load %arg15[%c0_9, %c0_10, %c0_11] : memref<3x32x1xf32, #tpu.memory_space<vmem>>, vector<1x32x1xf32>
      %16 = vector.shape_cast %15 : vector<1x32x1xf32> to vector<32x1xf32>
      %17 = vector.broadcast %16 : vector<32x1xf32> to vector<32x256xf32>
      %18 = arith.mulf %14, %17 : vector<32x256xf32>
      %19 = arith.addf %12, %18 : vector<32x256xf32>
      %c1 = arith.constant 1 : index
      %c0_12 = arith.constant 0 : index
      %c0_13 = arith.constant 0 : index
      %c0_14 = arith.constant 0 : index
      %20 = vector.load %arg9[%c1, %c0_12, %c0_13, %c0_14] : memref<2x1x32x256xf32, #tpu.memory_space<vmem>>, vector<1x1x32x256xf32>
      %21 = vector.shape_cast %20 : vector<1x1x32x256xf32> to vector<32x256xf32>
      %c1_15 = arith.constant 1 : index
      %c0_16 = arith.constant 0 : index
      %c0_17 = arith.constant 0 : index
      %22 = vector.load %arg15[%c1_15, %c0_16, %c0_17] : memref<3x32x1xf32, #tpu.memory_space<vmem>>, vector<1x32x1xf32>
      %23 = vector.shape_cast %22 : vector<1x32x1xf32> to vector<32x1xf32>
      %24 = vector.broadcast %23 : vector<32x1xf32> to vector<32x256xf32>
      %25 = arith.mulf %21, %24 : vector<32x256xf32>
      %26 = arith.addf %19, %25 : vector<32x256xf32>
      %c0_18 = arith.constant 0 : index
      %c0_19 = arith.constant 0 : index
      %c0_20 = arith.constant 0 : index
      %27 = vector.load %arg10[%c0_18, %c0_19, %c0_20] : memref<1x32x256xf32, #tpu.memory_space<vmem>>, vector<1x32x256xf32>
      %28 = vector.shape_cast %27 : vector<1x32x256xf32> to vector<32x256xf32>
      %29 = vector.shape_cast %26 : vector<32x256xf32> to vector<1x32x256xf32>
      tpu.vector_store %arg10[%c0_18, %c0_19, %c0_20], %29 {strides = array<i32>} : memref<1x32x256xf32, #tpu.memory_space<vmem>>, vector<1x32x256xf32>,
    } else {
    }
    return
  }
  func.func @transform_0(%arg0: i32, %arg1: i32, %arg2: i32) -> (i32, i32, i32) {
    %c0_i32 = arith.constant 0 : i32
    %c0_i32_0 = arith.constant 0 : i32
    %c0_i32_1 = arith.constant 0 : i32
    return %arg0, %c0_i32, %c0_i32_0 : i32, i32, i32
  }
  func.func @transform_1(%arg0: i32, %arg1: i32, %arg2: i32) -> (i32, i32) {
    %c0_i32 = arith.constant 0 : i32
    %c0_i32_0 = arith.constant 0 : i32
    %c0_i32_1 = arith.constant 0 : i32
    return %c0_i32, %c0_i32_0 : i32, i32
  }
  func.func @transform_2(%arg0: i32, %arg1: i32, %arg2: i32) -> (i32, i32) {
    %c0_i32 = arith.constant 0 : i32
    %c0_i32_0 = arith.constant 0 : i32
    %c0_i32_1 = arith.constant 0 : i32
    return %c0_i32, %c0_i32_0 : i32, i32
  }
  func.func @transform_3(%arg0: i32, %arg1: i32, %arg2: i32) -> (i32, i32) {
    %c0_i32 = arith.constant 0 : i32
    %c0_i32_0 = arith.constant 0 : i32
    %c0_i32_1 = arith.constant 0 : i32
    return %c0_i32, %c0_i32_0 : i32, i32
  }
  func.func @transform_4(%arg0: i32, %arg1: i32, %arg2: i32) -> (i32, i32) {
    %c0_i32 = arith.constant 0 : i32
    %c0_i32_0 = arith.constant 0 : i32
    %c0_i32_1 = arith.constant 0 : i32
    return %c0_i32, %c0_i32_0 : i32, i32
  }
  func.func @transform_5(%arg0: i32, %arg1: i32, %arg2: i32) -> (i32, i32, i32, i32) {
    %c1_i32 = arith.constant 1 : i32
    %0 = arith.subi %c1_i32, %arg1 : i32
    %1 = arith.muli %arg2, %0 : i32
    %c0_i32 = arith.constant 0 : i32
    %2 = arith.muli %c0_i32, %arg1 : i32
    %3 = arith.addi %1, %2 : i32
    %c2_i32 = arith.constant 2 : i32
    %c0_i32_0 = arith.constant 0 : i32
    %c0_i32_1 = arith.constant 0 : i32
    return %c2_i32, %arg0, %c0_i32_0, %3 : i32, i32, i32, i32
  }
  func.func @transform_6(%arg0: i32, %arg1: i32, %arg2: i32) -> (i32, i32, i32, i32) {
    %0 = arith.muli %arg2, %arg1 : i32
    %c0_i32 = arith.constant 0 : i32
    %c0_i32_0 = arith.constant 0 : i32
    %c0_i32_1 = arith.constant 0 : i32
    return %c0_i32, %arg0, %c0_i32_0, %0 : i32, i32, i32, i32
  }
  func.func @transform_7(%arg0: i32, %arg1: i32, %arg2: i32) -> (i32, i32, i32) {
    %0 = arith.muli %arg2, %arg1 : i32
    %c0_i32 = arith.constant 0 : i32
    %c0_i32_0 = arith.constant 0 : i32
    return %arg0, %c0_i32, %0 : i32, i32, i32
  }
  func.func @transform_8(%arg0: i32, %arg1: i32, %arg2: i32) -> (i32, i32, i32) {
    %c0_i32 = arith.constant 0 : i32
    %c0_i32_0 = arith.constant 0 : i32
    %c0_i32_1 = arith.constant 0 : i32
    return %arg0, %c0_i32, %c0_i32_0 : i32, i32, i32
  }
}

</mosaic_0001>

<bundles_post_ra>
// kernel: tpu_custom_call.1
= control target key start
LH: loop header
LB: loop body
LE: loop exit
PB: predicated region body
PF: predicated region fallthrough
CT: control target
= control target key end

     0   :  { %s2072_s0 = inlined_call_operand.vmem [shape: f32[2,32,3], index: 0, kind: input, shape index: {}]   ;;  %s2073_s1 = inlined_call_operand.vmem [shape: f32[32,1], index: 1, kind: input, shape index: {}]   ;;  %s2074_s2 = inlined_call_operand.vmem [shape: f32[32,1], index: 2, kind: input, shape index: {}]   ;;  %s2075_s3 = inlined_call_operand.vmem [shape: f32[4,32], index: 3, kind: input, shape index: {}]   ;;  %s2076_s4 = inlined_call_operand.vmem [shape: f32[32,4], index: 4, kind: input, shape index: {}]   ;;  %s2077_s5 = inlined_call_operand.hbm [shape: f32[3,2,32,256], index: 5, kind: input, shape index: {}]   ;;  %s2078_s6 = inlined_call_operand.hbm [shape: f32[3,2,32,256], index: 6, kind: input, shape index: {}]   ;;  %s2079_s7 = inlined_call_operand.hbm [shape: f32[2,32,256], index: 7, kind: output, shape index: {0}]   ;;  %s2080_s8 = inlined_call_operand.vmem [shape: f32[2,32,3], index: 8, kind: output, shape index: {1}]  }
   0x1   :  { %2087 = sst [smem:[#allocation24_spill]] %s2077_s5 }
   0x2   :  { %14 = vsyncpa [#allocation7], 0 }
   0x3   :  { %16 = vsyncpa [#allocation7 + $0x1], 0 }
   0x4   :  { %17 = vsyncpa [#allocation10], 0 }
   0x5   :  { %19 = vsyncpa [#allocation10 + $0x1], 0 }
   0x6   :  { %20 = vsyncpa [#allocation8], 0 }
   0x7   :  { %22 = vsyncpa [#allocation8 + $0x1], 0  ;;  %s1683_s27 = smov 0   ;;  %s1685_s28 = smov 0  }
   0x8   :  { %s1687_s29 = smov 0   ;;  %s1689_s30 = smov 0  }
   0x9   :  { %s1691_s9 = smov 0   ;;  %s1693_s10 = smov 0  }
   0xa   :  { %s1695_s11 = smov 0   ;;  %s1697_s12 = smov 0  }
   0xb LB: > { %2088 = sst [smem:[#allocation18_spill]] %s1598_s29  ;;  %s1277_s13 = sadd.s32 4294967295, %s1618_s12   ;;  %s1618_s12 = sphi %s1697_s12, %s28_s12   ;;  %s1614_s11 = sphi %s1695_s11, %s2112_s11   ;;  %s1610_s10 = sphi %s1693_s10, %s2106_s10   ;;  %s1606_s9 = sphi %s1691_s9, %s2111_s9   ;;  %s1602_s30 = sphi %s1689_s30, %s2105_s30   ;;  %s1598_s29 = sphi %s1687_s29, %s2110_s29   ;;  %s1594_s28 = sphi %s1685_s28, %s2109_s28   ;;  %s1590_s27 = sphi %s1683_s27, %s2108_s27  }
   0xc   : > { %2089 = sst [smem:[#allocation19_spill]] %s1610_s10  ;;  %s1278_s14 = sadd.s32 4294967294, %s1618_s12  }
   0xd   : > { %s43_s15 = sadd.s32 1, %s1610_s10  ;;  %s47_s16 = sadd.s32 1, %s1614_s11 }
   0xe   : > { %p45_p0 = scmp.ge.s32.totalorder %s43_s15, 2  ;;  %s170_s17 = sadd.s32 1, %s1598_s29 }
   0xf   : > { %p177_p1 = scmp.ne.s32.totalorder %s1598_s29, %s1594_s28  ;;  %p178_p2 = scmp.eq.s32.totalorder %s1618_s12, 0 }
  0x10   : > { %s2114_s15 = smov (%p45_p0, %s43_s15), 0  ;;  %s2116_s16 = smov (!%p45_p0, %s47_s16), %s1614_s11 }
  0x11   : > { %2090 = sst [smem:[#allocation20_spill]] %s2114_s15  ;;  %p1734_p3 = por %p178_p2, %p177_p1 }
  0x12   : > { %p183_p4 = scmp.ne.s32.totalorder %s1594_s28, %s1590_s27  ;;  %p49_p5 = scmp.ge.s32.totalorder %s2116_s16, 2 }
  0x13   : > { %p184_p6 = scmp.eq.s32.totalorder %s1277_s13, 0  ;;  %p241_p7 = scmp.eq.s32.totalorder %s1277_s13, 3 }
  0x14   : > { %p247_p8 = scmp.eq.s32.totalorder %s1278_s14, 3  ;;  %s2118_s16 = smov (%p49_p5, %s2116_s16), 0 }
  0x15   : > { %2092 = sst [smem:[#allocation21_spill]] %s2118_s16  ;;  %p1742_p9 = por %p184_p6, %p183_p4 }
  0x16   : > { %p1746_p10 = por %p241_p7, %p177_p1  ;;  %s165_s21 = ssub.s32 %s1614_s11, %s2118_s16 }
  0x17   : > { %p1752_p11 = por %p247_p8, %p183_p4  ;;  %p168_p12 = scmp.eq.s32.totalorder %s165_s21, 0 }
  0x18   : > { %s2094_s20 = scalar_select %p1746_p10, 1, 0 }
  0x19   : > { %s2095_s22 = scalar_select %p1752_p11, 1, 0 }
  0x1a   : > { %s1757_s23 = scalar_select %p168_p12, %s1598_s29, %s170_s17  }
  0x1b   : > { %2096 = sst [smem:[#allocation22_spill]] %s2095_s22  ;;  %p1280_p13 = scmp.ge.s32.totalorder %s1618_s12, 4 }
  0x1c   : > { %2097 = sst [smem:[#allocation23_spill]] %s1757_s23  ;;  %s1761_s24 = sand.u32 (!%p1280_p13), 1, %s1598_s29  }
  0x1d   : > { %301 = sbr.rel (%p1280_p13) target bundleno = 73 (0x49), region = 32  ;;  %s2085_s25 = sshll.u32 (!%p1280_p13), %s1614_s11, 10 }
  0x1e   : > { %s1281_s26 = sshll.u32 (!%p1280_p13), %s1761_s24, 6  ;;  %s2098_s5 = sld [smem:[#allocation24_spill]] (!%p1280_p13) }
  0x1f   : > { %s317_s16 = scalar_lea.vmem (!%p1280_p13), [#allocation6], %s1281_s26  ;;  %s314_s10 = scalar_lea.sflag (!%p1280_p13), [#allocation7], %s1761_s24 }
  0x20   : > { %s329_s15 = sshll.u32 (!%p1280_p13), %s317_s16, 4  ;;  %s1772_s15 = int_to_ptr.vmem [resolvable:$true] %s329_s15 }
  0x24   : > { %s1163_s21 = scalar_lea.hbm %s2098_s5, %s2085_s25  ;;  %s1491_s13 = scalar_lea.hbm %s2098_s5, 6144 }
  0x25   : > { %s1770_s17 = scalar_lea.hbm %s1163_s21, 4096  ;;  %s1515_s23 = scalar_lea.hbm %s1163_s21, 5120 }
  0x26   : > { %p1488_p0 = scmp.ne.s32.totalorder %s1770_s17, %s1515_s23  ;;  %p1492_p4 = scmp.lt.u32.totalorder %s1770_s17, %s2098_s5 }
  0x27   : > { %p1493_p5 = scmp.lt.u32.totalorder %s1491_s13, %s1515_s23  ;;  %p1495_p7 = scmp.lt.u32.totalorder %s1515_s23, %s1770_s17 }
  0x28   : > { %p1489_p1 = pnand %p1488_p0, %p1734_p3 }
  0x29   : > { %p1494_p6 = por %p1493_p5, %p1492_p4 }
  0x2a   : > { %p1490_p2 = pneg %p1489_p1 }
  0x2b   : > { %p1496_p8 = por %p1495_p7, %p1494_p6 }
  0x2d   : > { %p1497_p12 = pnand %p1496_p8, %p1490_p2 }
  0x2f   : > { %1500 = shalt.err (!%p1497_p12)
}
  0x30   : > { %s1501_s16 = scalar_lea.vmem %s1772_s15, 1024  ;;  %s1620_s29 = smov [#allocation6]  }
  0x31   : > { %p1502_p13 = scmp.ne.s32.totalorder %s1772_s15, %s1501_s16  ;;  %s1505_s22 = sshll.u32 %s1620_s29, 4  ;;  %s1506_s22 = int_to_ptr.vmem [resolvable:$false] %s1505_s22 }
  0x32   : > { %s1507_s25 = scalar_lea.vmem %s1506_s22, 2048  ;;  %p1508_p11 = scmp.lt.s32.totalorder %s1772_s15, %s1506_s22 }
  0x33   : > { %p1503_p0 = pnand %p1502_p13, %p1734_p3  ;;  %p1509_p10 = scmp.lt.s32.totalorder %s1507_s25, %s1501_s16 }
  0x35   : > { %p1504_p1 = pneg %p1503_p0  ;;  %p1510_p4 = por %p1509_p10, %p1508_p11 }
  0x37   : > { %p1511_p5 = pnand %p1510_p4, %p1504_p1 }
  0x39   : > { %1514 = shalt.err (!%p1511_p5)
}
  0x3a   : > { %s1621_s23 = smov 256   ;;  %s1622_s26 = smov 16  }
  0x3b   : > { %1365 = dma.hbm_to_vmem [thread:$0]  (%p1734_p3), %s1770_s17, 1024, %s1772_s15, %s314_s10, %s1621_s23, %s1621_s23, %s1622_s26  }
  0x3c   : > { %s1284_s21 = sshll.u32 %s1761_s24, 7  ;;  %s2099_s13 = sshll.u32 %s1614_s11, 10 }
  0x3d   : > { %s352_s29 = scalar_lea.hbm %s2078_s6, %s2099_s13  ;;  %s343_s25 = scalar_lea.vmem [#allocation9], %s1284_s21 }
  0x3e   : > { %s1366_s22 = scalar_select %p1734_p3, [#allocation0], [#allocation14] }
  0x3f   : > { %s365_s5 = sshll.u32 %s343_s25, 4  ;;  %s1623_s15 = smov 2048   ;;  %s366_s5 = int_to_ptr.vmem [resolvable:$true] %s365_s5 }
  0x40   : > { %s357_s10 = sld [smem:[%s1366_s22]]   ;;  %s1624_s17 = smov 1024  }
  0x41   : > { %1367 = sst [smem:[#allocation13]] (%p1734_p3), %s1623_s15  ;;  %s1625_s23 = smov 4  }
  0x42   : > { %1368 = sst [smem:[#allocation13 + $0x1]] (%p1734_p3), %s1624_s17  ;;  %s1626_s26 = smov 256  }
  0x43   : > { %1369 = sst [smem:[#allocation13 + $0x2]] (%p1734_p3), %s1625_s23  ;;  %s1627_s13 = smov 16  }
  0x44   : > { %1370 = sst [smem:[#allocation13 + $0x3]] (%p1734_p3), %s1626_s26  ;;  %s340_s16 = scalar_lea.sflag [#allocation10], %s1761_s24 }
  0x45   : > { %1371 = sst [smem:[#allocation13 + $0x4]] (%p1734_p3), %s1626_s26  ;;  %s1628_s22 = smov [#allocation12]  }
  0x46   : > { %s1287_s21 = sshll.u32 %s357_s10, 26  ;;  %1372 = sst [smem:[#allocation13 + $0x5]] (%p1734_p3), %s1627_s13 }
  0x47   : > { %s1288_s14 = sadd.s32 134217728, %s1287_s21 }
  0x48   : > { %1373 = dma.general (%p1734_p3), %s352_s29, 2048, %s366_s5, %s340_s16, %s1628_s22, [#allocation13], %s1288_s14, 0  }
  0x49 PF: > { %p1289_p10 = scmp.ge.s32.totalorder %s1618_s12, 1  ;;  %p386_p11 = scmp.lt.s32.totalorder %s1618_s12, 5 }
  0x4b   : > { %p387_p2 = pnand %p1289_p10, %p386_p11 }
  0x4c   : > { %s1823_s25 = sand.u32 (!%p387_p2), 1, %s1594_s28  }
  0x4d   : > { %390 = sbr.rel (%p387_p2) target bundleno = 1669 (0x685), region = 48  ;;  %s1290_s10 = sshll.u32 (!%p387_p2), %s1823_s25, 6 }
  0x4e   : > { %s393_s15 = scalar_lea.sflag (!%p387_p2), [#allocation7], %s1823_s25  ;;  %s1827_s17 = scalar_lea.vmem (!%p387_p2), [#allocation6], %s1290_s10 }
  0x54   : > { %1577 = dma.done.wait (%p1742_p9), %s393_s15, 1024  }
  0x55   : > { %1579 = vsyncadd (%p1742_p9), %s393_s15, 4294966272  ;;  %s1291_s5 = sshll.u32 %s1823_s25, 7  ;;  %s402_s18 = scalar_lea.sflag [#allocation10], %s1823_s25 }
  0x56   : > { %s1835_s24 = scalar_lea.vmem [#allocation9], %s1291_s5 }
  0x57   : > { %1581 = dma.done.wait (%p1742_p9), %s402_s18, 2048  }
  0x58   : > { %1583 = vsyncadd (%p1742_p9), %s402_s18, 4294965248  ;;  %p453_p3 = scmp.lt.s32.totalorder %s1606_s9, 1  ;;  %s1853_s15 = scalar_lea.vmem [#allocation11], %s1290_s10 }
  0x59   : > { %p1297_p6 = scmp.ne.s32.totalorder %s1602_s30, 0 }
  0x5a   : > { %s454_s29 = scalar_select %p453_p3, %s1606_s9, 1 }
  0x5b   : > { %473 = sbr.rel (%p1297_p6) target bundleno = 1483 (0x5cb), region = 60  ;;  %v487_v0 = vld [vmem:[%s1827_s17] sm:$0xff] (!%p1297_p6)  ;;  %v488_v1 = vld [vmem:[%s1827_s17 + $0x8] sm:$0xff] (!%p1297_p6)  ;;  %v489_v2 = vld [vmem:[%s1827_s17 + $0x10] sm:$0xff] (!%p1297_p6)  ;;  %vm478_vm0 = vcmask (!%p1297_p6), 7168   ;;  %v1629_v14 = vmov (!%p1297_p6), 0.0  }
  0x5c   : > { %s1327_s23 = sshll.u32 %s454_s29, 5  ;;  %499 = vst [vmem:[#allocation2 + $0x8] sm:$0xff] (!%p1297_p6), %v488_v1  ;;  %v510_v3 = vadd.f32 (!%p1297_p6), %v488_v1, %v487_v0  ;;  %498 = vst [vmem:[#allocation2] sm:$0xff] (!%p1297_p6), %v487_v0  ;;  %v535_v4 = vmax.f32 (!%p1297_p6), %v487_v0, %v488_v1  ;;  %v490_v5 = vld [vmem:[%s1827_s17 + $0x18] sm:$0xff] (!%p1297_p6)  ;;  %v491_v6 = vld [vmem:[%s1827_s17 + $0x20] sm:$0xff] (!%p1297_p6)  ;;  %v1630_v17 = vmov (!%p1297_p6), -inf  }
  0x5d   : > { %s1846_s13 = scalar_lea.vmem %s2072_s0, %s1327_s23  ;;  %s1851_s22 = scalar_lea.vmem %s2080_s8, %s1327_s23  ;;  %500 = vst [vmem:[#allocation2 + $0x10] sm:$0xff] (!%p1297_p6), %v489_v2  ;;  %v492_v7 = vld [vmem:[%s1827_s17 + $0x28] sm:$0xff] (!%p1297_p6)  ;;  %501 = vst [vmem:[#allocation2 + $0x18] sm:$0xff] (!%p1297_p6), %v490_v5  ;;  %v493_v8 = vld [vmem:[%s1827_s17 + $0x30] sm:$0xff] (!%p1297_p6)  ;;  %v513_v10 = vadd.f32 (!%p1297_p6), %v490_v5, %v489_v2  ;;  %v538_v11 = vmax.f32 (!%p1297_p6), %v489_v2, %v490_v5  ;;  %v1631_v18 = vmov (!%p1297_p6), 0   ;;  %vm660_vm2 = vcmask (!%p1297_p6), 23552  }
  0x5e   : > { %502 = vst [vmem:[#allocation2 + $0x20] sm:$0xff] (!%p1297_p6), %v491_v6  ;;  %503 = vst [vmem:[#allocation2 + $0x28] sm:$0xff] (!%p1297_p6), %v492_v7  ;;  %v494_v9 = vld [vmem:[%s1827_s17 + $0x38] sm:$0xff] (!%p1297_p6)  ;;  %511 = vadd.xlane.f32.xlu0 (!%p1297_p6), %v510_v3  ;;  %536 = vmax.xlane.f32.xlu1 (!%p1297_p6), %v535_v4  ;;  %v516_v12 = vadd.f32 (!%p1297_p6), %v492_v7, %v491_v6  ;;  %v541_v15 = vmax.f32 (!%p1297_p6), %v491_v6, %v492_v7  ;;  %v574_v35 = vld [vmem:[%s2074_s2] sm:$0xff] (!%p1297_p6)  ;;  %vm1633_vm3 = vmmov (!%p1297_p6), 0   ;;  %vm677_vm4 = vcmask (!%p1297_p6), 261120  }
  0x5f   : > { %504 = vst [vmem:[#allocation2 + $0x30] sm:$0xff] (!%p1297_p6), %v493_v8  ;;  %505 = vst [vmem:[#allocation2 + $0x38] sm:$0xff] (!%p1297_p6), %v494_v9  ;;  %v519_v13 = vadd.f32 (!%p1297_p6), %v494_v9, %v493_v8  ;;  %v544_v16 = vmax.f32 (!%p1297_p6), %v493_v8, %v494_v9  ;;  %1463 = vset.pattern.permute.xlu0 (!%p1297_p6), %v1631_v18  ;;  %1464 = vset.pattern.permute.xlu1 (!%p1297_p6), %v1631_v18  ;;  %v566_v39 = vld [vmem:[%s2073_s1] sm:$0xff] (!%p1297_p6)  ;;  %v575_v47 = vld [vmem:[%s2074_s2 + $0x8] sm:$0xff] (!%p1297_p6)  ;;  %vm751_vm5 = vcmask (!%p1297_p6), 19456   ;;  %vm763_vm6 = vcmask (!%p1297_p6), 31744  }
  0x60   : > { %479 = vst.msk [vmem:[#allocation3] sm:$0xff] (!%p1297_p6), %vm478_vm0, %v1629_v14  ;;  %480 = vst.msk [vmem:[#allocation3 + $0x8] sm:$0xff] (!%p1297_p6), %vm478_vm0, %v1629_v14  ;;  %v567_v52 = vld [vmem:[%s2073_s1 + $0x8] sm:$0xff] (!%p1297_p6)  ;;  %v569_v61 = vld [vmem:[%s2073_s1 + $0x18] sm:$0xff] (!%p1297_p6)  ;;  %1348 = vmatprep.mubr.msk.f32.mxu0 (!%p1297_p6), %vm1633_vm3, %v1629_v14  ;;  %vm776_vm7 = vcmask (!%p1297_p6), 1043456  }
  0x61   : > { %481 = vst.msk [vmem:[#allocation3 + $0x10] sm:$0xff] (!%p1297_p6), %vm478_vm0, %v1629_v14  ;;  %482 = vst.msk [vmem:[#allocation3 + $0x18] sm:$0xff] (!%p1297_p6), %vm478_vm0, %v1629_v14  ;;  %v568_v1 = vld [vmem:[%s2073_s1 + $0x10] sm:$0xff] (!%p1297_p6)  ;;  %v577_v3 = vld [vmem:[%s2074_s2 + $0x18] sm:$0xff] (!%p1297_p6) }
  0x62   : > { %514 = vadd.xlane.f32.xlu0 %v513_v10  ;;  %539 = vmax.xlane.f32.xlu1 %v538_v11  ;;  %483 = vst.msk [vmem:[#allocation4] sm:$0xff] %vm478_vm0, %v1630_v17  ;;  %484 = vst.msk [vmem:[#allocation4 + $0x8] sm:$0xff] %vm478_vm0, %v1630_v17  ;;  %v576_v2 = vld [vmem:[%s2074_s2 + $0x10] sm:$0xff] }
  0x63   : > { %485 = vst.msk [vmem:[#allocation4 + $0x10] sm:$0xff] %vm478_vm0, %v1630_v17  ;;  %486 = vst.msk [vmem:[#allocation4 + $0x18] sm:$0xff] %vm478_vm0, %v1630_v17 }
  0x66   : > { %517 = vadd.xlane.f32.xlu0 %v516_v12  ;;  %520 = vadd.xlane.f32.xlu1 %v519_v13 }
  0x67   : > { %v506_v19 = vld [vmem:[#allocation3] sm:$0xff]  ;;  %v507_v25 = vld [vmem:[#allocation3 + $0x8] sm:$0xff] }
  0x68   : > { %v508_v31 = vld [vmem:[#allocation3 + $0x10] sm:$0xff]  ;;  %v509_v32 = vld [vmem:[#allocation3 + $0x18] sm:$0xff] }
  0x69   : > { %v531_v20 = vld [vmem:[#allocation4] sm:$0xff]  ;;  %v532_v26 = vld [vmem:[#allocation4 + $0x8] sm:$0xff] }
  0x6a   : > { %542 = vmax.xlane.f32.xlu0 %v541_v15  ;;  %545 = vmax.xlane.f32.xlu1 %v544_v16  ;;  %v533_v38 = vld [vmem:[#allocation4 + $0x10] sm:$0xff]  ;;  %v534_v40 = vld [vmem:[#allocation4 + $0x18] sm:$0xff] }
  0xeb   : > { %v512_v21 = vpop.xlane.xlu0 %511  ;;  %v537_v22 = vpop.xlane.xlu1 %536 }
  0xec   : > { %v522_v23 = vadd.f32 %v512_v21, %v506_v19  ;;  %v547_v24 = vmax.f32 %v531_v20, %v537_v22 }
  0xee   : > { %527 = vst.msk [vmem:[#allocation3] sm:$0xff] %vm478_vm0, %v522_v23  ;;  %551 = vst.msk [vmem:[#allocation4] sm:$0xff] %vm478_vm0, %v547_v24 }
  0xef   : > { %v515_v27 = vpop.xlane.xlu0 %514  ;;  %v540_v28 = vpop.xlane.xlu1 %539 }
  0xf0   : > { %v523_v29 = vadd.f32 %v515_v27, %v507_v25  ;;  %v548_v30 = vmax.f32 %v532_v26, %v540_v28  ;;  %v623_v28 = vlaneseq }
  0xf2   : > { %528 = vst.msk [vmem:[#allocation3 + $0x8] sm:$0xff] %vm478_vm0, %v523_v29  ;;  %552 = vst.msk [vmem:[#allocation4 + $0x8] sm:$0xff] %vm478_vm0, %v548_v30  ;;  %v1908_v29 = vand.u32 127, %v623_v28 }
  0xf3   : > { %v518_v33 = vpop.xlane.xlu0 %517  ;;  %v521_v34 = vpop.xlane.xlu1 %520 }
  0xf4   : > { %v524_v36 = vadd.f32 %v518_v33, %v508_v31  ;;  %v525_v37 = vadd.f32 %v521_v34, %v509_v32  ;;  %vm625_vm1 = vcmp.eq.s32.totalorder %v1908_v29, 2  ;;  %v614_v31 = vld [vmem:[%s1846_s13] sm:$0xff]  ;;  %vm865_vm8 = vcmp.eq.s32.totalorder %v1908_v29, 0 }
  0xf5   : > { %v558_v41 = vld [vmem:[#allocation3] sm:$0xff]  ;;  %v1912_v30 = vsel %vm625_vm1, 1.0, %v1629_v14  ;;  %vm884_vm9 = vcmp.eq.s32.totalorder %v1908_v29, 1 }
  0xf6   : > { %v578_v42 = vld [vmem:[#allocation4] sm:$0xff]  ;;  %529 = vst.msk [vmem:[#allocation3 + $0x10] sm:$0xff] %vm478_vm0, %v524_v36  ;;  %530 = vst.msk [vmem:[#allocation3 + $0x18] sm:$0xff] %vm478_vm0, %v525_v37  ;;  %v562_v43 = vmul.f32 0.00390625, %v558_v41 }
  0xf7   : > { %v582_v44 = vmul.f32 %v578_v42, %v574_v35  ;;  %v543_v45 = vpop.xlane.xlu0 %542  ;;  %v546_v46 = vpop.xlane.xlu1 %545  ;;  %v615_v35 = vld [vmem:[%s1846_s13 + $0x8] sm:$0xff]  ;;  %v616_v42 = vld [vmem:[%s1846_s13 + $0x10] sm:$0xff] }
  0xf8   : > { %v549_v48 = vmax.f32 %v533_v38, %v543_v45  ;;  %v550_v49 = vmax.f32 %v534_v40, %v546_v46  ;;  %v570_v50 = vmul.f32 %v566_v39, %v562_v43 }
  0xf9   : > { %v559_v51 = vld [vmem:[#allocation3 + $0x8] sm:$0xff] }
  0xfa   : > { %v579_v53 = vld [vmem:[#allocation4 + $0x8] sm:$0xff]  ;;  %553 = vst.msk [vmem:[#allocation4 + $0x10] sm:$0xff] %vm478_vm0, %v549_v48  ;;  %554 = vst.msk [vmem:[#allocation4 + $0x18] sm:$0xff] %vm478_vm0, %v550_v49  ;;  %v586_v54 = vadd.f32 %v582_v44, %v570_v50  ;;  %v563_v55 = vmul.f32 0.00390625, %v559_v51 }
  0xfb   : > { %v583_v56 = vmul.f32 %v579_v53, %v575_v47  ;;  %v617_v47 = vld [vmem:[%s1846_s13 + $0x18] sm:$0xff] }
  0xfc   : > { %v1298_v57 = vmul.f32 -1.442695, %v586_v54  ;;  %v571_v58 = vmul.f32 %v567_v52, %v563_v55  ;;  %v1632_v55 = vmov 0.0|0.0  }
  0xfd   : > { %v560_v59 = vld [vmem:[#allocation3 + $0x10] sm:$0xff]  ;;  %v561_v60 = vld [vmem:[#allocation3 + $0x18] sm:$0xff]  ;;  %1359 = vmatprep.subr.bf16.mxu0 %v1632_v55 }
  0xfe   : > { %1465 = vpow2.f32 %v1298_v57  ;;  %v587_v62 = vadd.f32 %v583_v56, %v571_v58  ;;  %v564_v63 = vmul.f32 0.00390625, %v560_v59  ;;  %v565_v0 = vmul.f32 0.00390625, %v561_v60 }
 0x100   : > { %v1299_v4 = vmul.f32 -1.442695, %v587_v62  ;;  %v573_v5 = vmul.f32 %v569_v61, %v565_v0  ;;  %v572_v8 = vmul.f32 %v568_v1, %v564_v63 }
 0x101   : > { %v580_v6 = vld [vmem:[#allocation4 + $0x10] sm:$0xff]  ;;  %v581_v7 = vld [vmem:[#allocation4 + $0x18] sm:$0xff] }
 0x102   : > { %1467 = vpow2.f32 %v1299_v4  ;;  %v584_v9 = vmul.f32 %v580_v6, %v576_v2  ;;  %v585_v10 = vmul.f32 %v581_v7, %v577_v3  ;;  %v618_v2 = vld [vmem:[%s2075_s3] sm:$0xf] }
 0x104   : > { %v588_v11 = vadd.f32 %v584_v9, %v572_v8  ;;  %v589_v12 = vadd.f32 %v585_v10, %v573_v5 }
 0x106   : > { %v1300_v13 = vmul.f32 -1.442695, %v588_v11  ;;  %v1301_v15 = vmul.f32 -1.442695, %v589_v12  ;;  %v619_v11 = vld [vmem:[%s2076_s4] sm:$0xff] }
 0x107   : > { %1353 = vmatprep.mubr.msk.f32.mxu1 %vm763_vm6, %v619_v11 }
 0x108   : > { %v1466_v16 = vpop.eup %1465  ;;  %1469 = vpow2.f32 %v1300_v13 }
 0x109   : > { %v602_v17 = vadd.f32 1.0, %v1466_v16  ;;  %1471 = vpow2.f32 %v1301_v15  ;;  %v620_v16 = vld [vmem:[%s2076_s4 + $0x8] sm:$0xff] }
 0x10b   : > { %1473 = vrcp.f32 %v602_v17  ;;  %v621_v17 = vld [vmem:[%s2076_s4 + $0x10] sm:$0xff] }
 0x10c   : > { %v1468_v18 = vpop.eup %1467 }
 0x10d   : > { %v603_v19 = vadd.f32 1.0, %v1468_v18  ;;  %v622_v18 = vld [vmem:[%s2076_s4 + $0x18] sm:$0xff] }
 0x10f   : > { %1475 = vrcp.f32 %v603_v19  ;;  %v1309_v19 = vsel %vm865_vm8, 1.0, %v1629_v14 }
 0x112   : > { %v1470_v20 = vpop.eup %1469 }
 0x113   : > { %v1472_v21 = vpop.eup %1471  ;;  %v604_v22 = vadd.f32 1.0, %v1470_v20 }
 0x114   : > { %v605_v24 = vadd.f32 1.0, %v1472_v21  ;;  %v1310_v21 = vsel %vm884_vm9, 1.0, %v1629_v14 }
 0x115   : > { %v1474_v23 = vpop.eup %1473  ;;  %1477 = vrcp.f32 %v604_v22 }
 0x116   : > { %630 = vperm.xlu0 %1463, %v1474_v23   ;;  %1479 = vrcp.f32 %v605_v24 }
 0x119   : > { %v1476_v25 = vpop.eup %1475 }
 0x11a   : > { %635 = vperm.xlu1 %1464, %v1476_v25  }
 0x11f   : > { %v1478_v26 = vpop.eup %1477 }
 0x120   : > { %640 = vperm.xlu1 %1464, %v1478_v26   ;;  %v1480_v27 = vpop.eup %1479 }
 0x124   : > { %645 = vperm.xlu1 %1464, %v1480_v27  }
 0x195   : > { %v631_v32 = vpop.permute.xlu0 %630 }
 0x196   : > { %v648_v33 = vmul.f32 %v1912_v30, %v631_v32 }
 0x198   : > { %v652_v34 = vadd.f32 %v648_v33, %v614_v31 }
 0x199   : > { %v636_v36 = vpop.permute.xlu1 %635 }
 0x19a   : > { %919 = vst.msk [vmem:[%s1851_s22] sm:$0xff] %vm660_vm2, %v652_v34  ;;  %v649_v37 = vmul.f32 %v1912_v30, %v636_v36  ;;  %v656_v38 = vmul.f32 %v1912_v30, %v652_v34 }
 0x19c   : > { %v653_v39 = vadd.f32 %v649_v37, %v615_v35  ;;  %v661_v40 = vsel %vm660_vm2, %v656_v38, 0.0 }
 0x19d   : > { %662 = vadd.xlane.f32.xlu1 %v661_v40 }
 0x19e   : > { %920 = vst.msk [vmem:[%s1851_s22 + $0x8] sm:$0xff] %vm660_vm2, %v653_v39  ;;  %v657_v41 = vmul.f32 %v1912_v30, %v653_v39 }
 0x19f   : > { %v641_v43 = vpop.permute.xlu1 %640 }
 0x1a0   : > { %v650_v44 = vmul.f32 %v1912_v30, %v641_v43  ;;  %v664_v45 = vsel %vm660_vm2, %v657_v41, 0.0 }
 0x1a1   : > { %665 = vadd.xlane.f32.xlu0 %v664_v45 }
 0x1a2   : > { %v654_v46 = vadd.f32 %v650_v44, %v616_v42 }
 0x1a3   : > { %v646_v48 = vpop.permute.xlu1 %645 }
 0x1a4   : > { %921 = vst.msk [vmem:[%s1851_s22 + $0x10] sm:$0xff] %vm660_vm2, %v654_v46  ;;  %v651_v49 = vmul.f32 %v1912_v30, %v646_v48  ;;  %v658_v50 = vmul.f32 %v1912_v30, %v654_v46 }
 0x1a6   : > { %v655_v51 = vadd.f32 %v651_v49, %v617_v47  ;;  %v667_v52 = vsel %vm660_vm2, %v658_v50, 0.0 }
 0x1a7   : > { %668 = vadd.xlane.f32.xlu1 %v667_v52 }
 0x1a8   : > { %922 = vst.msk [vmem:[%s1851_s22 + $0x18] sm:$0xff] %vm660_vm2, %v655_v51  ;;  %v659_v53 = vmul.f32 %v1912_v30, %v655_v51 }
 0x1aa   : > { %v670_v54 = vsel %vm660_vm2, %v659_v53, 0.0 }
 0x1ab   : > { %671 = vadd.xlane.f32.xlu1 %v670_v54 }
 0x22a   : > { %v663_v56 = vpop.xlane.xlu1 %662 }
 0x22b   : > { %v673_v58 = vmul.f32 %v663_v56, %v652_v34 }
 0x22e   : > { %v666_v57 = vpop.xlane.xlu0 %665 }
 0x22f   : > { %v674_v59 = vmul.f32 %v666_v57, %v653_v39 }
 0x231   : > { %v1360_v60 = vpack.c.bf16 %v674_v59, %v673_v58 }
 0x233   : > { %1361 = vmatpush3.bf16.msra.mxu0 %v1360_v60 }
 0x234   : > { %v669_v61 = vpop.xlane.xlu1 %668  ;;  %1362 = vmatprep.subr.bf16.mxu0 %v1632_v55 }
 0x235   : > { %v675_v63 = vmul.f32 %v669_v61, %v654_v46 }
 0x238   : > { %v672_v62 = vpop.xlane.xlu1 %671 }
 0x239   : > { %v676_v0 = vmul.f32 %v672_v62, %v655_v51 }
 0x23b   : > { %v1363_v1 = vpack.c.bf16 %v676_v0, %v675_v63 }
 0x23d   : > { %1364 = vmatpush3.bf16.msra.mxu0 %v1363_v1 }
 0x240   : > { %1349 = vmatmul.mubr.msk.f32.vlgmr.msra.gmra.mrb[0].mxu0 %vm677_vm4, %v618_v2 }
 0x313   : > { %v747_v3 = vpop.f32.mrb[0].mxu0 }
 0x314   : > { %v1350_v4 = vpop.f32.mrb[1].mxu0  ;;  %v752_v5 = vsel %vm751_vm5, %v747_v3, -inf }
 0x315   : > { %753 = vmax.xlane.f32.xlu1 %v752_v5 }
 0x3a2   : > { %v754_v6 = vpop.xlane.xlu1 %753 }
 0x3a3   : > { %v755_v7 = vsub.f32 %v747_v3, %v754_v6 }
 0x3a5   : > { %v756_v8 = vmul.f32 1.442695, %v755_v7 }
 0x3a7   : > { %1481 = vpow2.f32 %v756_v8 }
 0x3b1   : > { %v1482_v9 = vpop.eup %1481 }
 0x3b2   : > { %v758_v10 = vsel %vm751_vm5, %v1482_v9, 0.0 }
 0x3b3   : > { %759 = vadd.xlane.f32.xlu1 %v758_v10 }
 0x440   : > { %v760_v12 = vpop.xlane.xlu1 %759 }
 0x441   : > { %1483 = vrcp.f32 %v760_v12 }
 0x44b   : > { %v1484_v13 = vpop.eup %1483 }
 0x44c   : > { %v762_v15 = vmul.f32 %v1484_v13, %v1482_v9 }
 0x44e   : > { %1351 = vmatprep.subr.msk.mxu1 %vm776_vm7, %v762_v15 }
 0x44f   : > { %1352 = vmatpush3.msk.msra.mxu1 %vm776_vm7, %v762_v15 }
 0x450   : > { %1354 = vmatmul.mubr.msk.f32.vlgmr.msra.gmra.mrb[0].mxu1 %vm763_vm6, %v620_v16 }
 0x451   : > { %1356 = vmatprep.mubr.msk.f32.mxu1 %vm763_vm6, %v621_v17 }
 0x454   : > { %1357 = vmatmul.mubr.msk.f32.gmra.mrb[2].mxu1 %vm763_vm6, %v622_v18 }
 0x523   : > { %v1355_v20 = vpop.f32.mrb[0].mxu1 }
 0x524   : > { %v846_v22 = vpop.f32.mrb[1].mxu1  ;;  %v869_v23 = vmul.f32 %v1355_v20, %v1309_v19  ;;  %v888_v26 = vmul.f32 %v1355_v20, %v1310_v21  ;;  %v904_v33 = vmul.f32 %v1355_v20, %v1912_v30 }
 0x525   : > { %v868_v24 = vmul.f32 %v1309_v19, %v846_v22  ;;  %v887_v28 = vmul.f32 %v1310_v21, %v846_v22  ;;  %v903_v34 = vmul.f32 %v1912_v30, %v846_v22 }
 0x526   : > { %v875_v25 = vsel %vm660_vm2, %v869_v23, 0.0  ;;  %v894_v29 = vsel %vm660_vm2, %v888_v26, 0.0  ;;  %v910_v37 = vsel %vm660_vm2, %v904_v33, 0.0 }
 0x527   : > { %876 = vadd.xlane.f32.xlu1 %v875_v25  ;;  %v872_v27 = vsel %vm660_vm2, %v868_v24, 0.0  ;;  %v1358_v31 = vpop.f32.mrb[2].mxu1  ;;  %v891_v14 = vsel %vm660_vm2, %v887_v28, 0.0  ;;  %v907_v38 = vsel %vm660_vm2, %v903_v34, 0.0 }
 0x528   : > { %873 = vadd.xlane.f32.xlu0 %v872_v27  ;;  %v856_v32 = vpop.f32.mrb[3].mxu1  ;;  %v871_v35 = vmul.f32 %v1358_v31, %v1309_v19  ;;  %v890_v41 = vmul.f32 %v1358_v31, %v1310_v21  ;;  %v906_v44 = vmul.f32 %v1358_v31, %v1912_v30 }
 0x529   : > { %v870_v36 = vmul.f32 %v1309_v19, %v856_v32  ;;  %v889_v42 = vmul.f32 %v1310_v21, %v856_v32  ;;  %v905_v45 = vmul.f32 %v1912_v30, %v856_v32 }
 0x52a   : > { %v881_v39 = vsel %vm660_vm2, %v871_v35, 0.0  ;;  %v900_v43 = vsel %vm660_vm2, %v890_v41, 0.0  ;;  %v916_v47 = vsel %vm660_vm2, %v906_v44, 0.0 }
 0x52b   : > { %895 = vadd.xlane.f32.xlu1 %v894_v29  ;;  %v878_v40 = vsel %vm660_vm2, %v870_v36, 0.0  ;;  %v897_v46 = vsel %vm660_vm2, %v889_v42, 0.0  ;;  %v913_v48 = vsel %vm660_vm2, %v905_v45, 0.0 }
 0x52c   : > { %892 = vadd.xlane.f32.xlu0 %v891_v14 }
 0x52f   : > { %911 = vadd.xlane.f32.xlu1 %v910_v37 }
 0x530   : > { %908 = vadd.xlane.f32.xlu0 %v907_v38 }
 0x533   : > { %882 = vadd.xlane.f32.xlu1 %v881_v39 }
 0x534   : > { %879 = vadd.xlane.f32.xlu0 %v878_v40 }
 0x537   : > { %901 = vadd.xlane.f32.xlu1 %v900_v43 }
 0x538   : > { %898 = vadd.xlane.f32.xlu0 %v897_v46 }
 0x53b   : > { %917 = vadd.xlane.f32.xlu1 %v916_v47 }
 0x53c   : > { %914 = vadd.xlane.f32.xlu0 %v913_v48 }
 0x5b4   : > { %v877_v49 = vpop.xlane.xlu1 %876 }
 0x5b5   : > { %924 = vst.msk [vmem:[#allocation5 + $0x8] sm:$0xff] %vm478_vm0, %v877_v49  ;;  %v874_v50 = vpop.xlane.xlu0 %873 }
 0x5b6   : > { %923 = vst.msk [vmem:[#allocation5] sm:$0xff] %vm478_vm0, %v874_v50 }
 0x5b8   : > { %v896_v51 = vpop.xlane.xlu1 %895 }
 0x5b9   : > { %929 = vst.msk [vmem:[#allocation5 + $0x28] sm:$0xff] %vm478_vm0, %v896_v51  ;;  %v893_v30 = vpop.xlane.xlu0 %892 }
 0x5ba   : > { %928 = vst.msk [vmem:[#allocation5 + $0x20] sm:$0xff] %vm478_vm0, %v893_v30 }
 0x5bc   : > { %v912_v52 = vpop.xlane.xlu1 %911 }
 0x5bd   : > { %934 = vst.msk [vmem:[#allocation5 + $0x48] sm:$0xff] %vm478_vm0, %v912_v52  ;;  %v909_v53 = vpop.xlane.xlu0 %908 }
 0x5be   : > { %933 = vst.msk [vmem:[#allocation5 + $0x40] sm:$0xff] %vm478_vm0, %v909_v53 }
 0x5c0   : > { %v883_v54 = vpop.xlane.xlu1 %882 }
 0x5c1   : > { %926 = vst.msk [vmem:[#allocation5 + $0x18] sm:$0xff] %vm478_vm0, %v883_v54  ;;  %v880_v55 = vpop.xlane.xlu0 %879 }
 0x5c2   : > { %925 = vst.msk [vmem:[#allocation5 + $0x10] sm:$0xff] %vm478_vm0, %v880_v55 }
 0x5c4   : > { %v902_v56 = vpop.xlane.xlu1 %901 }
 0x5c5   : > { %931 = vst.msk [vmem:[#allocation5 + $0x38] sm:$0xff] %vm478_vm0, %v902_v56  ;;  %v899_v57 = vpop.xlane.xlu0 %898 }
 0x5c6   : > { %930 = vst.msk [vmem:[#allocation5 + $0x30] sm:$0xff] %vm478_vm0, %v899_v57 }
 0x5c8   : > { %v918_v58 = vpop.xlane.xlu1 %917 }
 0x5c9   : > { %936 = vst.msk [vmem:[#allocation5 + $0x58] sm:$0xff] %vm478_vm0, %v918_v58  ;;  %v915_v59 = vpop.xlane.xlu0 %914 }
 0x5ca   : > { %935 = vst.msk [vmem:[#allocation5 + $0x50] sm:$0xff] %vm478_vm0, %v915_v59 }
 0x5cb PF: > { %p1311_p9 = scmp.ne.s32.totalorder %s1602_s30, 1 }
 0x5cc   : > { %v953_v61 = vld [vmem:[#allocation5 + $0x40] sm:$0xff] (!%p1311_p9)  ;;  %v1634_v62 = vmov (!%p1311_p9), 0   ;;  %v954_v0 = vld [vmem:[#allocation5 + $0x48] sm:$0xff] (!%p1311_p9)  ;;  %v996_v3 = vld [vmem:[#allocation5 + $0x18] sm:$0xff] (!%p1311_p9) }
 0x5cd   : > { %940 = sbr.rel (%p1311_p9) target bundleno = 1643 (0x66b), region = 72  ;;  %1486 = vset.pattern.permute.xlu1 (!%p1311_p9), %v1634_v62  ;;  %1485 = vset.pattern.permute.xlu0 (!%p1311_p9), %v1634_v62  ;;  %v994_v1 = vld [vmem:[#allocation5 + $0x8] sm:$0xff] (!%p1311_p9)  ;;  %v993_v2 = vld [vmem:[#allocation5] sm:$0xff] (!%p1311_p9)  ;;  %v995_v4 = vld [vmem:[#allocation5 + $0x10] sm:$0xff] (!%p1311_p9) }
 0x5ce   : > { %959 = vperm.xlu0 (!%p1311_p9), %1485, %v953_v61   ;;  %v1044_v5 = vld [vmem:[#allocation5 + $0x28] sm:$0xff] (!%p1311_p9)  ;;  %v1043_v6 = vld [vmem:[#allocation5 + $0x20] sm:$0xff] (!%p1311_p9)  ;;  %v1046_v7 = vld [vmem:[#allocation5 + $0x38] sm:$0xff] (!%p1311_p9) }
 0x5cf   : > { %v1045_v8 = vld [vmem:[#allocation5 + $0x30] sm:$0xff] (!%p1311_p9)  ;;  %v988_v15 = vld [vmem:[%s1835_s24 + $0x18] sm:$0xff] (!%p1311_p9)  ;;  %v985_v17 = vld [vmem:[%s1835_s24] sm:$0xff] (!%p1311_p9) }
 0x5d0   : > { %v956_v63 = vld [vmem:[#allocation5 + $0x58] sm:$0xff] (!%p1311_p9)  ;;  %v987_v13 = vld [vmem:[%s1835_s24 + $0x10] sm:$0xff] (!%p1311_p9)  ;;  %v986_v18 = vld [vmem:[%s1835_s24 + $0x8] sm:$0xff] (!%p1311_p9) }
 0x5d1   : > { %v955_v60 = vld [vmem:[#allocation5 + $0x50] sm:$0xff] (!%p1311_p9)  ;;  %v944_v20 = vld [vmem:[#allocation2] sm:$0xff] (!%p1311_p9)  ;;  %v945_v21 = vld [vmem:[#allocation2 + $0x8] sm:$0xff] (!%p1311_p9) }
 0x5d2   : > { %969 = vperm.xlu1 (!%p1311_p9), %1486, %v955_v60   ;;  %964 = vperm.xlu0 (!%p1311_p9), %1485, %v954_v0   ;;  %v946_v22 = vld [vmem:[#allocation2 + $0x10] sm:$0xff] (!%p1311_p9)  ;;  %v947_v23 = vld [vmem:[#allocation2 + $0x18] sm:$0xff] (!%p1311_p9)  ;;  %v948_v33 = vld [vmem:[#allocation2 + $0x20] sm:$0xff] (!%p1311_p9) }
 0x5d3   : > { %v991_v28 = vld [vmem:[%s1835_s24 + $0x30] sm:$0xff] (!%p1311_p9)  ;;  %v992_v31 = vld [vmem:[%s1835_s24 + $0x38] sm:$0xff] (!%p1311_p9)  ;;  %v989_v37 = vld [vmem:[%s1835_s24 + $0x20] sm:$0xff] (!%p1311_p9) }
 0x5d4   : > { %v990_v38 = vld [vmem:[%s1835_s24 + $0x28] sm:$0xff]  ;;  %v1314_v39 = vld [vmem:[%s1835_s24 + $0x50] sm:$0xff]  ;;  %v1315_v40 = vld [vmem:[%s1835_s24 + $0x58] sm:$0xff] }
 0x5d5   : > { %v1312_v41 = vld [vmem:[%s1835_s24 + $0x40] sm:$0xff]  ;;  %v1313_v42 = vld [vmem:[%s1835_s24 + $0x48] sm:$0xff]  ;;  %v950_v44 = vld [vmem:[#allocation2 + $0x30] sm:$0xff] }
 0x5d6   : > { %974 = vperm.xlu1 %1486, %v956_v63   ;;  %999 = vperm.xlu0 %1485, %v993_v2   ;;  %v949_v43 = vld [vmem:[#allocation2 + $0x28] sm:$0xff]  ;;  %v951_v45 = vld [vmem:[#allocation2 + $0x38] sm:$0xff]  ;;  %v1318_v59 = vld [vmem:[%s1835_s24 + $0x70] sm:$0xff] }
 0x5d7   : > { %v1319_v0 = vld [vmem:[%s1835_s24 + $0x78] sm:$0xff]  ;;  %v1317_v2 = vld [vmem:[%s1835_s24 + $0x68] sm:$0xff] }
 0x5da   : > { %1004 = vperm.xlu1 %1486, %v994_v1   ;;  %1009 = vperm.xlu0 %1485, %v995_v4   ;;  %v1316_v1 = vld [vmem:[%s1835_s24 + $0x60] sm:$0xff] }
 0x5de   : > { %1014 = vperm.xlu1 %1486, %v996_v3   ;;  %1049 = vperm.xlu0 %1485, %v1043_v6  }
 0x5e2   : > { %1054 = vperm.xlu1 %1486, %v1044_v5   ;;  %1059 = vperm.xlu0 %1485, %v1045_v8  }
 0x5e6   : > { %1064 = vperm.xlu1 %1486, %v1046_v7  }
 0x64d   : > { %v960_v10 = vpop.permute.xlu0 %959 }
 0x64e   : > { %v977_v14 = vmul.f32 %v960_v10, %v944_v20  ;;  %v978_v34 = vmul.f32 %v960_v10, %v945_v21 }
 0x651   : > { %v970_v9 = vpop.permute.xlu1 %969  ;;  %v965_v12 = vpop.permute.xlu0 %964 }
 0x652   : > { %v979_v35 = vmul.f32 %v965_v12, %v946_v22  ;;  %v980_v36 = vmul.f32 %v965_v12, %v947_v23  ;;  %v981_v60 = vmul.f32 %v970_v9, %v948_v33  ;;  %v982_v61 = vmul.f32 %v970_v9, %v949_v43 }
 0x655   : > { %v975_v11 = vpop.permute.xlu1 %974  ;;  %v1000_v19 = vpop.permute.xlu0 %999 }
 0x656   : > { %v1017_v26 = vmul.f32 %v1000_v19, %v985_v17  ;;  %v1018_v27 = vmul.f32 %v1000_v19, %v986_v18  ;;  %v983_v62 = vmul.f32 %v975_v11, %v950_v44  ;;  %v984_v63 = vmul.f32 %v975_v11, %v951_v45 }
 0x658   : > { %v1025_v48 = vadd.f32 %v1017_v26, %v977_v14  ;;  %v1026_v49 = vadd.f32 %v1018_v27, %v978_v34 }
 0x659   : > { %v1005_v16 = vpop.permute.xlu1 %1004  ;;  %v1010_v29 = vpop.permute.xlu0 %1009 }
 0x65a   : > { %v1019_v24 = vmul.f32 %v1005_v16, %v987_v13  ;;  %v1020_v25 = vmul.f32 %v1005_v16, %v988_v15  ;;  %v1021_v30 = vmul.f32 %v1010_v29, %v989_v37  ;;  %v1022_v52 = vmul.f32 %v1010_v29, %v990_v38 }
 0x65c   : > { %v1027_v46 = vadd.f32 %v1019_v24, %v979_v35  ;;  %v1028_v47 = vadd.f32 %v1020_v25, %v980_v36  ;;  %v1029_v10 = vadd.f32 %v1021_v30, %v981_v60  ;;  %v1030_v12 = vadd.f32 %v1022_v52, %v982_v61 }
 0x65d   : > { %v1015_v32 = vpop.permute.xlu1 %1014  ;;  %v1050_v54 = vpop.permute.xlu0 %1049 }
 0x65e   : > { %v1023_v50 = vmul.f32 %v1015_v32, %v991_v28  ;;  %v1024_v51 = vmul.f32 %v1015_v32, %v992_v31  ;;  %v1067_v57 = vmul.f32 %v1312_v41, %v1050_v54  ;;  %v1068_v58 = vmul.f32 %v1313_v42, %v1050_v54 }
 0x660   : > { %v1075_v5 = vadd.f32 %v1067_v57, %v1025_v48  ;;  %v1076_v6 = vadd.f32 %v1068_v58, %v1026_v49  ;;  %v1031_v7 = vadd.f32 %v1023_v50, %v983_v62  ;;  %v1032_v8 = vadd.f32 %v1024_v51, %v984_v63 }
 0x661   : > { %v1055_v53 = vpop.permute.xlu1 %1054  ;;  %v1060_v13 = vpop.permute.xlu0 %1059 }
 0x662   : > { %v1069_v55 = vmul.f32 %v1314_v39, %v1055_v53  ;;  %v1070_v56 = vmul.f32 %v1315_v40, %v1055_v53  ;;  %1083 = vst [vmem:[%s1853_s15] sm:$0xff] %v1075_v5  ;;  %1084 = vst [vmem:[%s1853_s15 + $0x8] sm:$0xff] %v1076_v6  ;;  %v1071_v16 = vmul.f32 %v1316_v1, %v1060_v13 }
 0x663   : > { %v1072_v17 = vmul.f32 %v1317_v2, %v1060_v13 }
 0x664   : > { %v1077_v3 = vadd.f32 %v1069_v55, %v1027_v46  ;;  %v1078_v4 = vadd.f32 %v1070_v56, %v1028_v47  ;;  %v1079_v20 = vadd.f32 %v1071_v16, %v1029_v10 }
 0x665   : > { %v1065_v9 = vpop.permute.xlu1 %1064  ;;  %v1080_v21 = vadd.f32 %v1072_v17, %v1030_v12 }
 0x666   : > { %1085 = vst [vmem:[%s1853_s15 + $0x10] sm:$0xff] %v1077_v3  ;;  %1086 = vst [vmem:[%s1853_s15 + $0x18] sm:$0xff] %v1078_v4  ;;  %v1073_v11 = vmul.f32 %v1318_v59, %v1065_v9  ;;  %v1074_v15 = vmul.f32 %v1319_v0, %v1065_v9 }
 0x667   : > { %1087 = vst [vmem:[%s1853_s15 + $0x20] sm:$0xff] %v1079_v20  ;;  %1088 = vst [vmem:[%s1853_s15 + $0x28] sm:$0xff] %v1080_v21 }
 0x668   : > { %v1081_v18 = vadd.f32 %v1073_v11, %v1031_v7  ;;  %v1082_v19 = vadd.f32 %v1074_v15, %v1032_v8 }
 0x66a   : > { %1089 = vst [vmem:[%s1853_s15 + $0x30] sm:$0xff] %v1081_v18  ;;  %1090 = vst [vmem:[%s1853_s15 + $0x38] sm:$0xff] %v1082_v19 }
 0x66b PF: > { %s1329_s30 = sshll.u32 %s1606_s9, 10  ;;  %s1113_s18 = sshll.u32 %s1853_s15, 4  ;;  %s2018_s18 = int_to_ptr.vmem [resolvable:$true] %s1113_s18 }
 0x66c   : > { %s2015_s5 = scalar_lea.hbm %s2079_s7, %s1329_s30  ;;  %s1092_s13 = scalar_lea.sflag [#allocation8], %s1823_s25 }
 0x66d   : > { %s1516_s22 = scalar_lea.vmem %s2018_s18, 1024  ;;  %p2100_p8 = scmp.ne.s32.totalorder %s2094_s20, 0 }
 0x66e   : > { %p1517_p7 = scmp.ne.s32.totalorder %s2018_s18, %s1516_s22  ;;  %s1635_s29 = smov [#allocation11]  }
 0x66f   : > { %s1520_s23 = sshll.u32 %s1635_s29, 4  ;;  %s1521_s23 = int_to_ptr.vmem [resolvable:$false] %s1520_s23 }
 0x670   : > { %p1518_p12 = pnand %p1517_p7, %p2100_p8  ;;  %s1522_s9 = scalar_lea.vmem %s1521_s23, 2048 }
 0x671   : > { %p1523_p0 = scmp.lt.s32.totalorder %s2018_s18, %s1521_s23  ;;  %p1524_p1 = scmp.lt.s32.totalorder %s1522_s9, %s1516_s22 }
 0x672   : > { %p1519_p13 = pneg %p1518_p12 }
 0x673   : > { %p1525_p4 = por %p1524_p1, %p1523_p0 }
 0x675   : > { %p1526_p5 = pnand %p1525_p4, %p1519_p13 }
 0x677   : > { %1529 = shalt.err (!%p1526_p5)
}
 0x678   : > { %s1530_s15 = scalar_lea.hbm %s2015_s5, 1024  ;;  %s1534_s14 = scalar_lea.hbm %s2079_s7, 2048 }
 0x679   : > { %p1531_p10 = scmp.ne.s32.totalorder %s2015_s5, %s1530_s15  ;;  %p1535_p3 = scmp.lt.u32.totalorder %s2015_s5, %s2079_s7 }
 0x67a   : > { %p1536_p6 = scmp.lt.u32.totalorder %s1534_s14, %s1530_s15  ;;  %p1538_p7 = scmp.lt.u32.totalorder %s1530_s15, %s2015_s5 }
 0x67b   : > { %p1532_p11 = pnand %p1531_p10, %p2100_p8 }
 0x67c   : > { %p1537_p9 = por %p1536_p6, %p1535_p3 }
 0x67d   : > { %p1533_p2 = pneg %p1532_p11 }
 0x67e   : > { %p1539_p12 = por %p1538_p7, %p1537_p9 }
 0x680   : > { %p1540_p13 = pnand %p1539_p12, %p1533_p2 }
 0x682   : > { %1543 = shalt.err (!%p1540_p13)
}
 0x683   : > { %s1636_s10 = smov 256   ;;  %s1637_s30 = smov 16  }
 0x684   : > { %1376 = dma.vmem_to_hbm [thread:$0]  (%p2100_p8), %s2018_s18, 1024, %s2015_s5, %s1092_s13, %s1636_s10, %s1636_s10, %s1637_s30  }
 0x685 PF: > { %s2101_s24 = sld [smem:[#allocation22_spill]]  ;;  %p1382_p0 = scmp.ge.s32.totalorder %s1618_s12, 2 }
 0x686   : > { %s1131_s17 = sand.u32 1, %s1590_s27  }
 0x687   : > { %s1132_s22 = scalar_lea.sflag [#allocation8], %s1131_s17 }
 0x68b   : > { %p2102_p1 = scmp.ne.s32.totalorder %s2101_s24, 0 }
 0x68d   : > { %p1379_p4 = pnand %p1382_p0, %p2102_p1 }
 0x68f   : > { %1585 = dma.done.wait (!%p1379_p4), %s1132_s22, 1024  }
 0x690   : > { %1587 = vsyncadd (!%p1379_p4), %s1132_s22, 4294966272  ;;  %s28_s12 = sadd.s32 1, %s1618_s12   ;;  %s2103_s29 = sld [smem:[#allocation18_spill]] }
 0x691   : > { %p25_p5 = scmp.ge.s32.totalorder %s28_s12, 6   ;;  %s2104_s23 = sld [smem:[#allocation23_spill]] }
 0x692   : > { %s2105_s30 = sld [smem:[#allocation19_spill]]  ;;  %s2106_s10 = sld [smem:[#allocation20_spill]] }
 0x693   : > { %s2107_s20 = sld [smem:[#allocation21_spill]]  ;;  %s2108_s27 = smov %s1594_s28 }
 0x694   : > { %s2111_s9 = smov %s1614_s11  ;;  %27 = sbr.rel (!%p25_p5) target bundleno = 11 (0xb), region = 149 }
 0x696   : > { %s2109_s28 = smov %s2103_s29 }
 0x697   : > { %s2110_s29 = smov %s2104_s23 }
 0x699   : > { %s2112_s11 = smov %s2107_s20 }
 0x69b   :  { %1145 = vsyncpa [#allocation7], 1 }
 0x69c   :  { %1147 = vsyncpa [#allocation7 + $0x1], 1 }
 0x69d   :  { %1148 = vsyncpa [#allocation10], 1 }
 0x69e   :  { %1150 = vsyncpa [#allocation10 + $0x1], 1 }
 0x69f   :  { %1151 = vsyncpa [#allocation8], 1 }
 0x6a0   :  { %1153 = vsyncpa [#allocation8 + $0x1], 1 }

</bundles_post_ra>
